<compile_context>
chip_gen: v7x
topology: tpu7x:2x2x1
jax: 0.10.0
libtpu: 0.0.40
codegen_flags: <defaults>
</compile_context>

<pallas_src>
import math

import jax
import jax.numpy as jnp
from jax import lax
from jax.experimental import pallas as pl
from jax.experimental.pallas import tpu as pltpu


_BN_EPS = 1e-5         # nn.BatchNorm1d default eps
_LEAKY_SLOPE = 0.2     # nn.LeakyReLU(0.2)
_LANE = 128


# --------------------------- parameter packing --------------------------------
def _pack_aux(params, hidden_dims, img_size):
    """Concatenate all (1, dim) vector params into one lane-aligned (1, total) slab."""
    pieces = []
    offsets = {}
    off = 0

    def add(name, arr):
        nonlocal off
        d = int(arr.shape[-1])
        slot = ((d + _LANE - 1) // _LANE) * _LANE          # lane-aligned slot
        offsets[name] = (off, d)
        pieces.append(jnp.pad(arr.reshape(1, d).astype(jnp.float32),
                              ((0, 0), (0, slot - d))))
        off += slot

    for i, _d in enumerate(hidden_dims, start=1):
        add(f"b{i}", params[f"b{i}"])
        add(f"g{i}", params[f"g{i}"])
        add(f"beta{i}", params[f"beta{i}"])
    add("b4", params["b4"])

    aux = jnp.concatenate(pieces, axis=1)
    return aux, offsets


# ----------------------------- Pallas kernel ----------------------------------
def _make_kernel(offsets, img_size):
    inv_n = 1.0 / float(img_size)   # BinaryStraightThrough threshold = 1/img_size (static)

    def kernel(x_ref, w1_ref, w2_ref, w3_ref, w4_ref, aux_ref, ybin_ref, avg_ref):
        def aux(name):
            off, d = offsets[name]
            return aux_ref[:, off:off + d]                 # static, lane-aligned slice

        def hidden_block(h, w_ref, i):
            # Linear (MXU, f32 accumulation) + bias.  Activations cast to the weight dtype
            # (no-op for f32; bf16 halves MXU passes when the opt-in flag is set).
            z = jnp.dot(h.astype(w_ref.dtype), w_ref[...],
                        preferred_element_type=jnp.float32) + aux(f"b{i}")
            # LeakyReLU(0.2).
            z = jnp.maximum(z, _LEAKY_SLOPE * z)
            # BatchNorm1d (training mode, biased batch stats), one-pass + fused affine.
            mu = jnp.mean(z, axis=0, keepdims=True)
            var = jnp.maximum(jnp.mean(z * z, axis=0, keepdims=True) - mu * mu, 0.0)
            scale = aux(f"g{i}") * lax.rsqrt(var + _BN_EPS)
            shift = aux(f"beta{i}") - mu * scale
            return z * scale + shift
            # TODO(synk): running_mean/running_var updates (stateful BN side effect) are
            # not produced; only the forward data path is reproduced.

        h = x_ref[...]
        h = hidden_block(h, w1_ref, 1)
        h = hidden_block(h, w2_ref, 2)
        h = hidden_block(h, w3_ref, 3)

        # Last Linear -> ValueExtractor tap -> SigmoidSoftmax -> BinaryStraightThrough.
        z = jnp.dot(h.astype(w4_ref.dtype), w4_ref[...],
                    preferred_element_type=jnp.float32) + aux("b4")
        avg_ref[...] = jnp.mean(z, axis=0, keepdims=True)          # ValueExtractor.value

        # Sigmoid on the EUP (mathematically identical to 1/(1+exp(-z)), no inf transient).
        s = 0.5 * jnp.tanh(0.5 * z) + 0.5
        # Softmax(dim=1): s in (0,1) so exp never overflows -> no max subtraction.
        # Binary output needs only p > 1/N  <=>  exp(s) > sum(exp(s)) / N, so no divide.
        e = jnp.exp(s)
        row_thr = jnp.sum(e, axis=1, keepdims=True) * inv_n        # (B, 1)
        # STE forward value: (p > thr).int() + (p - p.detach()) == hard 0/1.
        ybin_ref[...] = (e > row_thr).astype(ybin_ref.dtype)

        # TODO(synk): torch.autograd.detect_anomaly / "Generator produced NaN" raise has no
        # in-kernel equivalent (no dynamic raise); omitted.
        # TODO(synk): forward-only; the straight-through / BN / LeakyReLU backward would need
        # a custom_vjp — jax.grad through this pallas_call is not wired up.

    return kernel


# -------------------------------- wrapper --------------------------------------
def generator_sigmoid_softmax_ste(x, params, matmul_dtype=jnp.float32):
    """x: [B, latent_size] f32.  matmul_dtype=jnp.bfloat16 is an opt-in numeric change
    (bf16 MXU inputs, f32 accumulation); elementwise math always stays f32."""
    batch, _ = x.shape
    img_size = int(params["w4"].shape[1])
    hidden_dims = [int(params[f"w{i}"].shape[1]) for i in range(1, 4)]

    aux, offsets = _pack_aux(params, hidden_dims, img_size)
    ws = [params[f"w{i}"].astype(matmul_dtype) for i in range(1, 5)]

    vmem = lambda: pl.BlockSpec(memory_space=pltpu.MemorySpace.VMEM)

    y_bin, avg_value = pl.pallas_call(
        _make_kernel(offsets, img_size),
        out_shape=(
            jax.ShapeDtypeStruct((batch, img_size), jnp.float32),   # binarized output
            jax.ShapeDtypeStruct((1, img_size), jnp.float32),       # ValueExtractor.value
        ),
        in_specs=[vmem() for _ in range(6)],
        out_specs=(vmem(), vmem()),
    )(x, *ws, aux)
    return y_bin, avg_value


# ------------------------------- init glue -------------------------------------
def init_params(key, latent_size, img_size, amount_layers=4):
    """Mirrors Generator_big.__init__ sizing: increase = log_{amount_layers}(img/latent)."""
    rel_size = int(img_size / latent_size)
    increase = math.log(rel_size, amount_layers)
    dims = [max(round(increase ** k * latent_size), 1) for k in range(amount_layers)]

    def linear(k, fan_in, fan_out):
        kw, kb = jax.random.split(k)
        bound = 1.0 / math.sqrt(fan_in)
        w = jax.random.uniform(kw, (fan_in, fan_out), jnp.float32, -bound, bound)
        b = jax.random.uniform(kb, (1, fan_out), jnp.float32, -bound, bound)
        return w, b

    keys = jax.random.split(key, amount_layers)
    params = {}
    for i in range(1, amount_layers):                 # hidden blocks 1..3
        w, b = linear(keys[i - 1], dims[i - 1], dims[i])
        params[f"w{i}"] = w
        params[f"b{i}"] = b
        params[f"g{i}"] = jnp.ones((1, dims[i]), jnp.float32)      # BN gamma
        params[f"beta{i}"] = jnp.zeros((1, dims[i]), jnp.float32)  # BN beta
    w4, b4 = linear(keys[-1], dims[amount_layers - 1], img_size)   # last Linear -> img_size
    params["w4"] = w4
    params["b4"] = b4
    return params


# ----------------------- pure-JAX reference (original math) --------------------
def _reference_forward(x, params):
    def hidden(h, w, b, g, bt):
        z = jnp.dot(h, w, preferred_element_type=jnp.float32) + b
        z = jnp.where(z >= 0.0, z, _LEAKY_SLOPE * z)
        mu = jnp.mean(z, axis=0, keepdims=True)
        var = jnp.mean((z - mu) ** 2, axis=0, keepdims=True)
        return (z - mu) * lax.rsqrt(var + _BN_EPS) * g + bt

    h = x
    for i in range(1, 4):
        h = hidden(h, params[f"w{i}"], params[f"b{i}"], params[f"g{i}"], params[f"beta{i}"])
    z = jnp.dot(h, params["w4"], preferred_element_type=jnp.float32) + params["b4"]
    avg = jnp.mean(z, axis=0, keepdims=True)
    s = 1.0 / (1.0 + jnp.exp(-z))
    s = s - jnp.max(s, axis=1, keepdims=True)
    e = jnp.exp(s)
    p = e / jnp.sum(e, axis=1, keepdims=True)
    thr = 1.0 / z.shape[1]
    return (p > thr).astype(jnp.float32), avg, p


if __name__ == "__main__":
    key = jax.random.PRNGKey(0)
    k_params, k_x = jax.random.split(key)

    # Module-consistent small shapes: latent=16, img=256 -> dims 16->32->64->128->256.
    # Batch = 128 (multiple of 8 sublanes) so the MXU rows are actually filled.
    latent_size, img_size, batch = 16, 256, 128
    params = init_params(k_params, latent_size, img_size)
    x = jax.random.normal(k_x, (batch, latent_size), jnp.float32)

    # Default (exact module numerics: f32 matmuls).
    y_bin, avg_value = generator_sigmoid_softmax_ste(x, params)
    y_bin = jax.block_until_ready(y_bin)
    avg_value = jax.block_until_ready(avg_value)

    ref_bin, ref_avg, ref_p = _reference_forward(x, params)

    assert y_bin.shape == (batch, img_size) and y_bin.dtype == jnp.float32
    assert avg_value.shape == (1, img_size)
    assert bool(jnp.all((y_bin == 0.0) | (y_bin == 1.0)))
    assert bool(jnp.allclose(avg_value, ref_avg, rtol=1e-3, atol=1e-3))
    # Binary outputs may only differ where the softmax value sits within float rounding of
    # the 1/img_size threshold; ignore that measure-zero band.
    thr = 1.0 / img_size
    near_thr = jnp.abs(ref_p - thr) < 1e-5
    assert bool(jnp.all((y_bin == ref_bin) | near_thr))

    # Opt-in bf16-matmul fast path (numeric change flagged by the perf review): just check
    # it runs and produces a valid hard-binary output of the right shape.
    y_bf16, avg_bf16 = generator_sigmoid_softmax_ste(x, params, matmul_dtype=jnp.bfloat16)
    y_bf16 = jax.block_until_ready(y_bf16)
    avg_bf16 = jax.block_until_ready(avg_bf16)
    assert y_bf16.shape == (batch, img_size)
    assert avg_bf16.shape == (1, img_size)
    assert bool(jnp.all((y_bf16 == 0.0) | (y_bf16 == 1.0)))

    print("KERNEL_OK")
</pallas_src>

<mosaic_0001>
module attributes {stable_mosaic.version = 11 : i64} {
  func.func @kernel(%arg0: memref<128x16xf32, #tpu.memory_space<vmem>>, %arg1: memref<16x32xf32, #tpu.memory_space<vmem>>, %arg2: memref<32x64xf32, #tpu.memory_space<vmem>>, %arg3: memref<64x128xf32, #tpu.memory_space<vmem>>, %arg4: memref<128x256xf32, #tpu.memory_space<vmem>>, %arg5: memref<1x1408xf32, #tpu.memory_space<vmem>>, %arg6: memref<128x256xf32, #tpu.memory_space<vmem>>, %arg7: memref<1x256xf32, #tpu.memory_space<vmem>>) attributes {dimension_semantics = [], scalar_prefetch = 0 : i64, scratch_operands = 0 : i64, tpu.core_type = #tpu.core_type<tc>} {
    %c0 = arith.constant 0 : index
    %c0_0 = arith.constant 0 : index
    %0 = vector.load %arg0[%c0, %c0_0] : memref<128x16xf32, #tpu.memory_space<vmem>>, vector<128x16xf32>
    %c0_1 = arith.constant 0 : index
    %c0_2 = arith.constant 0 : index
    %1 = vector.load %arg1[%c0_1, %c0_2] : memref<16x32xf32, #tpu.memory_space<vmem>>, vector<16x32xf32>
    %cst = arith.constant dense<0.000000e+00> : vector<128x32xf32>
    %2 = tpu.matmul %0, %1, %cst {dimension_numbers = #tpu.dot_dimension_numbers<[1], [0], [0], [1], [0, 0, 1, 1], [], []>} : vector<128x16xf32>, vector<16x32xf32>, vector<128x32xf32> -> vector<128x32xf32>
    %c0_3 = arith.constant 0 : index
    %c0_4 = arith.constant 0 : index
    %3 = vector.load %arg5[%c0_3, %c0_4] : memref<1x1408xf32, #tpu.memory_space<vmem>>, vector<1x32xf32>
    %4 = vector.broadcast %3 : vector<1x32xf32> to vector<128x32xf32>
    %5 = arith.addf %2, %4 : vector<128x32xf32>
    %cst_5 = arith.constant 2.000000e-01 : f32
    %6 = vector.broadcast %cst_5 : f32 to vector<128x32xf32>
    %7 = arith.mulf %6, %5 : vector<128x32xf32>
    %8 = arith.maximumf %5, %7 : vector<128x32xf32>
    %cst_6 = arith.constant dense<0.000000e+00> : vector<32xf32>
    %9 = vector.multi_reduction <add>, %8, %cst_6 [0] : vector<128x32xf32> to vector<32xf32>
    %10 = vector.shape_cast %9 : vector<32xf32> to vector<1x32xf32>
    %cst_7 = arith.constant 1.280000e+02 : f32
    %11 = vector.broadcast %cst_7 : f32 to vector<1x32xf32>
    %12 = arith.divf %10, %11 : vector<1x32xf32>
    %13 = arith.mulf %8, %8 : vector<128x32xf32>
    %cst_8 = arith.constant dense<0.000000e+00> : vector<32xf32>
    %14 = vector.multi_reduction <add>, %13, %cst_8 [0] : vector<128x32xf32> to vector<32xf32>
    %15 = vector.shape_cast %14 : vector<32xf32> to vector<1x32xf32>
    %cst_9 = arith.constant 1.280000e+02 : f32
    %16 = vector.broadcast %cst_9 : f32 to vector<1x32xf32>
    %17 = arith.divf %15, %16 : vector<1x32xf32>
    %18 = arith.mulf %12, %12 : vector<1x32xf32>
    %19 = arith.subf %17, %18 : vector<1x32xf32>
    %cst_10 = arith.constant 0.000000e+00 : f32
    %20 = vector.broadcast %cst_10 : f32 to vector<1x32xf32>
    %21 = arith.maximumf %19, %20 : vector<1x32xf32>
    %c0_11 = arith.constant 0 : index
    %c128 = arith.constant 128 : index
    %22 = vector.load %arg5[%c0_11, %c128] : memref<1x1408xf32, #tpu.memory_space<vmem>>, vector<1x32xf32>
    %cst_12 = arith.constant 9.99999974E-6 : f32
    %23 = vector.broadcast %cst_12 : f32 to vector<1x32xf32>
    %24 = arith.addf %21, %23 : vector<1x32xf32>
    %25 = math.rsqrt %24 : vector<1x32xf32>
    %26 = arith.mulf %22, %25 : vector<1x32xf32>
    %c0_13 = arith.constant 0 : index
    %c256 = arith.constant 256 : index
    %27 = vector.load %arg5[%c0_13, %c256] : memref<1x1408xf32, #tpu.memory_space<vmem>>, vector<1x32xf32>
    %28 = arith.mulf %12, %26 : vector<1x32xf32>
    %29 = arith.subf %27, %28 : vector<1x32xf32>
    %30 = vector.broadcast %26 : vector<1x32xf32> to vector<128x32xf32>
    %31 = arith.mulf %8, %30 : vector<128x32xf32>
    %32 = vector.broadcast %29 : vector<1x32xf32> to vector<128x32xf32>
    %33 = arith.addf %31, %32 : vector<128x32xf32>
    %c0_14 = arith.constant 0 : index
    %c0_15 = arith.constant 0 : index
    %34 = vector.load %arg2[%c0_14, %c0_15] : memref<32x64xf32, #tpu.memory_space<vmem>>, vector<32x64xf32>
    %cst_16 = arith.constant dense<0.000000e+00> : vector<128x64xf32>
    %35 = tpu.matmul %33, %34, %cst_16 {dimension_numbers = #tpu.dot_dimension_numbers<[1], [0], [0], [1], [0, 0, 1, 1], [], []>} : vector<128x32xf32>, vector<32x64xf32>, vector<128x64xf32> -> vector<128x64xf32>
    %c0_17 = arith.constant 0 : index
    %c384 = arith.constant 384 : index
    %36 = vector.load %arg5[%c0_17, %c384] : memref<1x1408xf32, #tpu.memory_space<vmem>>, vector<1x64xf32>
    %37 = vector.broadcast %36 : vector<1x64xf32> to vector<128x64xf32>
    %38 = arith.addf %35, %37 : vector<128x64xf32>
    %cst_18 = arith.constant 2.000000e-01 : f32
    %39 = vector.broadcast %cst_18 : f32 to vector<128x64xf32>
    %40 = arith.mulf %39, %38 : vector<128x64xf32>
    %41 = arith.maximumf %38, %40 : vector<128x64xf32>
    %cst_19 = arith.constant dense<0.000000e+00> : vector<64xf32>
    %42 = vector.multi_reduction <add>, %41, %cst_19 [0] : vector<128x64xf32> to vector<64xf32>
    %43 = vector.shape_cast %42 : vector<64xf32> to vector<1x64xf32>
    %cst_20 = arith.constant 1.280000e+02 : f32
    %44 = vector.broadcast %cst_20 : f32 to vector<1x64xf32>
    %45 = arith.divf %43, %44 : vector<1x64xf32>
    %46 = arith.mulf %41, %41 : vector<128x64xf32>
    %cst_21 = arith.constant dense<0.000000e+00> : vector<64xf32>
    %47 = vector.multi_reduction <add>, %46, %cst_21 [0] : vector<128x64xf32> to vector<64xf32>
    %48 = vector.shape_cast %47 : vector<64xf32> to vector<1x64xf32>
    %cst_22 = arith.constant 1.280000e+02 : f32
    %49 = vector.broadcast %cst_22 : f32 to vector<1x64xf32>
    %50 = arith.divf %48, %49 : vector<1x64xf32>
    %51 = arith.mulf %45, %45 : vector<1x64xf32>
    %52 = arith.subf %50, %51 : vector<1x64xf32>
    %cst_23 = arith.constant 0.000000e+00 : f32
    %53 = vector.broadcast %cst_23 : f32 to vector<1x64xf32>
    %54 = arith.maximumf %52, %53 : vector<1x64xf32>
    %c0_24 = arith.constant 0 : index
    %c512 = arith.constant 512 : index
    %55 = vector.load %arg5[%c0_24, %c512] : memref<1x1408xf32, #tpu.memory_space<vmem>>, vector<1x64xf32>
    %cst_25 = arith.constant 9.99999974E-6 : f32
    %56 = vector.broadcast %cst_25 : f32 to vector<1x64xf32>
    %57 = arith.addf %54, %56 : vector<1x64xf32>
    %58 = math.rsqrt %57 : vector<1x64xf32>
    %59 = arith.mulf %55, %58 : vector<1x64xf32>
    %c0_26 = arith.constant 0 : index
    %c640 = arith.constant 640 : index
    %60 = vector.load %arg5[%c0_26, %c640] : memref<1x1408xf32, #tpu.memory_space<vmem>>, vector<1x64xf32>
    %61 = arith.mulf %45, %59 : vector<1x64xf32>
    %62 = arith.subf %60, %61 : vector<1x64xf32>
    %63 = vector.broadcast %59 : vector<1x64xf32> to vector<128x64xf32>
    %64 = arith.mulf %41, %63 : vector<128x64xf32>
    %65 = vector.broadcast %62 : vector<1x64xf32> to vector<128x64xf32>
    %66 = arith.addf %64, %65 : vector<128x64xf32>
    %c0_27 = arith.constant 0 : index
    %c0_28 = arith.constant 0 : index
    %67 = vector.load %arg3[%c0_27, %c0_28] : memref<64x128xf32, #tpu.memory_space<vmem>>, vector<64x128xf32>
    %cst_29 = arith.constant dense<0.000000e+00> : vector<128x128xf32>
    %68 = tpu.matmul %66, %67, %cst_29 {dimension_numbers = #tpu.dot_dimension_numbers<[1], [0], [0], [1], [0, 0, 1, 1], [], []>} : vector<128x64xf32>, vector<64x128xf32>, vector<128x128xf32> -> vector<128x128xf32>
    %c0_30 = arith.constant 0 : index
    %c768 = arith.constant 768 : index
    %69 = vector.load %arg5[%c0_30, %c768] : memref<1x1408xf32, #tpu.memory_space<vmem>>, vector<1x128xf32>
    %70 = vector.broadcast %69 : vector<1x128xf32> to vector<128x128xf32>
    %71 = arith.addf %68, %70 : vector<128x128xf32>
    %cst_31 = arith.constant 2.000000e-01 : f32
    %72 = vector.broadcast %cst_31 : f32 to vector<128x128xf32>
    %73 = arith.mulf %72, %71 : vector<128x128xf32>
    %74 = arith.maximumf %71, %73 : vector<128x128xf32>
    %cst_32 = arith.constant dense<0.000000e+00> : vector<128xf32>
    %75 = vector.multi_reduction <add>, %74, %cst_32 [0] : vector<128x128xf32> to vector<128xf32>
    %76 = vector.shape_cast %75 : vector<128xf32> to vector<1x128xf32>
    %cst_33 = arith.constant 1.280000e+02 : f32
    %77 = vector.broadcast %cst_33 : f32 to vector<1x128xf32>
    %78 = arith.divf %76, %77 : vector<1x128xf32>
    %79 = arith.mulf %74, %74 : vector<128x128xf32>
    %cst_34 = arith.constant dense<0.000000e+00> : vector<128xf32>
    %80 = vector.multi_reduction <add>, %79, %cst_34 [0] : vector<128x128xf32> to vector<128xf32>
    %81 = vector.shape_cast %80 : vector<128xf32> to vector<1x128xf32>
    %cst_35 = arith.constant 1.280000e+02 : f32
    %82 = vector.broadcast %cst_35 : f32 to vector<1x128xf32>
    %83 = arith.divf %81, %82 : vector<1x128xf32>
    %84 = arith.mulf %78, %78 : vector<1x128xf32>
    %85 = arith.subf %83, %84 : vector<1x128xf32>
    %cst_36 = arith.constant 0.000000e+00 : f32
    %86 = vector.broadcast %cst_36 : f32 to vector<1x128xf32>
    %87 = arith.maximumf %85, %86 : vector<1x128xf32>
    %c0_37 = arith.constant 0 : index
    %c896 = arith.constant 896 : index
    %88 = vector.load %arg5[%c0_37, %c896] : memref<1x1408xf32, #tpu.memory_space<vmem>>, vector<1x128xf32>
    %cst_38 = arith.constant 9.99999974E-6 : f32
    %89 = vector.broadcast %cst_38 : f32 to vector<1x128xf32>
    %90 = arith.addf %87, %89 : vector<1x128xf32>
    %91 = math.rsqrt %90 : vector<1x128xf32>
    %92 = arith.mulf %88, %91 : vector<1x128xf32>
    %c0_39 = arith.constant 0 : index
    %c1024 = arith.constant 1024 : index
    %93 = vector.load %arg5[%c0_39, %c1024] : memref<1x1408xf32, #tpu.memory_space<vmem>>, vector<1x128xf32>
    %94 = arith.mulf %78, %92 : vector<1x128xf32>
    %95 = arith.subf %93, %94 : vector<1x128xf32>
    %96 = vector.broadcast %92 : vector<1x128xf32> to vector<128x128xf32>
    %97 = arith.mulf %74, %96 : vector<128x128xf32>
    %98 = vector.broadcast %95 : vector<1x128xf32> to vector<128x128xf32>
    %99 = arith.addf %97, %98 : vector<128x128xf32>
    %c0_40 = arith.constant 0 : index
    %c0_41 = arith.constant 0 : index
    %100 = vector.load %arg4[%c0_40, %c0_41] : memref<128x256xf32, #tpu.memory_space<vmem>>, vector<128x256xf32>
    %cst_42 = arith.constant dense<0.000000e+00> : vector<128x256xf32>
    %101 = tpu.matmul %99, %100, %cst_42 {dimension_numbers = #tpu.dot_dimension_numbers<[1], [0], [0], [1], [0, 0, 1, 1], [], []>} : vector<128x128xf32>, vector<128x256xf32>, vector<128x256xf32> -> vector<128x256xf32>
    %c0_43 = arith.constant 0 : index
    %c1152 = arith.constant 1152 : index
    %102 = vector.load %arg5[%c0_43, %c1152] : memref<1x1408xf32, #tpu.memory_space<vmem>>, vector<1x256xf32>
    %103 = vector.broadcast %102 : vector<1x256xf32> to vector<128x256xf32>
    %104 = arith.addf %101, %103 : vector<128x256xf32>
    %cst_44 = arith.constant dense<0.000000e+00> : vector<256xf32>
    %105 = vector.multi_reduction <add>, %104, %cst_44 [0] : vector<128x256xf32> to vector<256xf32>
    %106 = vector.shape_cast %105 : vector<256xf32> to vector<1x256xf32>
    %cst_45 = arith.constant 1.280000e+02 : f32
    %107 = vector.broadcast %cst_45 : f32 to vector<1x256xf32>
    %108 = arith.divf %106, %107 : vector<1x256xf32>
    %c0_46 = arith.constant 0 : index
    %c0_47 = arith.constant 0 : index
    %109 = vector.load %arg7[%c0_46, %c0_47] : memref<1x256xf32, #tpu.memory_space<vmem>>, vector<1x256xf32>
    tpu.vector_store %arg7[%c0_46, %c0_47], %108 {strides = array<i32>} : memref<1x256xf32, #tpu.memory_space<vmem>>, vector<1x256xf32>,
    %cst_48 = arith.constant 5.000000e-01 : f32
    %110 = vector.broadcast %cst_48 : f32 to vector<128x256xf32>
    %111 = arith.mulf %110, %104 : vector<128x256xf32>
    %112 = math.tanh %111 : vector<128x256xf32>
    %cst_49 = arith.constant 5.000000e-01 : f32
    %113 = vector.broadcast %cst_49 : f32 to vector<128x256xf32>
    %114 = arith.mulf %113, %112 : vector<128x256xf32>
    %cst_50 = arith.constant 5.000000e-01 : f32
    %115 = vector.broadcast %cst_50 : f32 to vector<128x256xf32>
    %116 = arith.addf %114, %115 : vector<128x256xf32>
    %117 = math.exp %116 : vector<128x256xf32>
    %cst_51 = arith.constant dense<0.000000e+00> : vector<128xf32>
    %118 = vector.multi_reduction <add>, %117, %cst_51 [1] : vector<128x256xf32> to vector<128xf32>
    %119 = vector.shape_cast %118 : vector<128xf32> to vector<128x1xf32>
    %cst_52 = arith.constant 3.906250e-03 : f32
    %120 = vector.broadcast %cst_52 : f32 to vector<128x1xf32>
    %121 = arith.mulf %119, %120 : vector<128x1xf32>
    %122 = vector.broadcast %121 : vector<128x1xf32> to vector<128x256xf32>
    %123 = arith.cmpf ogt, %117, %122 : vector<128x256xf32>
    %124 = arith.extui %123 : vector<128x256xi1> to vector<128x256xi32>
    %125 = arith.sitofp %124 : vector<128x256xi32> to vector<128x256xf32>
    %c0_53 = arith.constant 0 : index
    %c0_54 = arith.constant 0 : index
    %126 = vector.load %arg6[%c0_53, %c0_54] : memref<128x256xf32, #tpu.memory_space<vmem>>, vector<128x256xf32>
    tpu.vector_store %arg6[%c0_53, %c0_54], %125 {strides = array<i32>} : memref<128x256xf32, #tpu.memory_space<vmem>>, vector<128x256xf32>,
    return
  }
}

</mosaic_0001>

<bundles_post_ra>
// kernel: tpu_custom_call.1
= control target key start
LH: loop header
LB: loop body
LE: loop exit
PB: predicated region body
PF: predicated region fallthrough
CT: control target
= control target key end

     0   :  { %13 = vsyncpa [#allocation3], 0  ;;  %s3326_s0 = inlined_call_operand.vmem [shape: f32[128,16], index: 0, kind: input, shape index: {}]   ;;  %s3327_s1 = inlined_call_operand.vmem [shape: f32[16,32], index: 1, kind: input, shape index: {}]   ;;  %s3328_s2 = inlined_call_operand.vmem [shape: f32[32,64], index: 2, kind: input, shape index: {}]   ;;  %s3329_s3 = inlined_call_operand.vmem [shape: f32[64,128], index: 3, kind: input, shape index: {}]   ;;  %s3330_s4 = inlined_call_operand.hbm [shape: f32[128,256], index: 4, kind: input, shape index: {}]   ;;  %s3331_s5 = inlined_call_operand.vmem [shape: f32[1,1408], index: 5, kind: input, shape index: {}]   ;;  %s3332_s6 = inlined_call_operand.hbm [shape: f32[128,256], index: 6, kind: output, shape index: {0}]   ;;  %s3333_s7 = inlined_call_operand.hbm [shape: f32[1,256], index: 7, kind: output, shape index: {1}]  }
   0x1   :  { %14 = vsyncpa [#allocation4], 0 }
   0x2   :  { %15 = vsyncpa [#allocation7], 0  ;;  %s2398_s24 = smov [#allocation2]   ;;  %s2326_s28 = scalar_lea.hbm %s3330_s4, 4096 }
   0x3   :  { %s29_s25 = sshll.u32 %s2398_s24, 4  ;;  %p2327_p0 = scmp.ne.s32.totalorder %s3330_s4, %s2326_s28  ;;  %s30_s25 = int_to_ptr.vmem [resolvable:$true] %s29_s25 }
   0x4   :  { %p2330_p1 = scmp.lt.u32.totalorder %s2326_s28, %s3330_s4 }
   0x6   :  { %p2332_p2 = pnand %p2330_p1, %p2327_p0 }
   0x8   :  { %2335 = shalt.err (!%p2332_p2)
}
   0x9   :  { %s2336_s10 = scalar_lea.vmem %s30_s25, 4096  ;;  %p2341_p4 = scmp.lt.s32.totalorder %s30_s25, %s30_s25 }
   0xa   :  { %p2337_p3 = scmp.ne.s32.totalorder %s30_s25, %s2336_s10  ;;  %p2342_p5 = scmp.lt.s32.totalorder %s2336_s10, %s2336_s10 }
   0xc   :  { %p2343_p6 = por %p2342_p5, %p2341_p4 }
   0xe   :  { %p2344_p7 = pnand %p2343_p6, %p2337_p3 }
  0x10   :  { %2347 = shalt.err (!%p2344_p7)
}
  0x11   :  { %s2399_s11 = smov 256   ;;  %s2400_s12 = smov 16  }
  0x12   :  { %35 = dma.hbm_to_vmem [thread:$0]  %s3330_s4, 4096, %s30_s25, [#allocation3], %s2399_s11, %s2399_s11, %s2400_s12  }
  0x13   :  { %2392 = dma.done.wait [#allocation3], 4096  }
  0x14   :  { %2393 = vsyncadd [#allocation3], 4294963200  ;;  %vm66_vm0 = vcmask 130048   ;;  %v57_v0 = vld [vmem:[%s3327_s1] sm:$0xff]  ;;  %v58_v1 = vld [vmem:[%s3327_s1 + $0x8] sm:$0xff]  ;;  %vm292_vm1 = vcmask 261120  }
  0x15   :  { %v41_v2 = vld [vmem:[%s3326_s0] sm:$0xff]  ;;  %v2109_v3 = vpack.c.bf16 %v58_v1, %v57_v0  ;;  %v42_v4 = vld [vmem:[%s3326_s0 + $0x8] sm:$0xff]  ;;  %v43_v5 = vld [vmem:[%s3326_s0 + $0x10] sm:$0xff]  ;;  %vm676_vm2 = vcmask 523264  }
  0x16   :  { %2013 = vmatprep.mubr.msk.f32.mxu0 %vm66_vm0, %v41_v2  ;;  %v44_v6 = vld [vmem:[%s3326_s0 + $0x18] sm:$0xff]  ;;  %v45_v7 = vld [vmem:[%s3326_s0 + $0x20] sm:$0xff]  ;;  %v46_v8 = vld [vmem:[%s3326_s0 + $0x28] sm:$0xff] }
  0x17   :  { %2110 = vmatprep.subr.bf16.mxu0 %v2109_v3  ;;  %v47_v9 = vld [vmem:[%s3326_s0 + $0x30] sm:$0xff]  ;;  %v48_v10 = vld [vmem:[%s3326_s0 + $0x38] sm:$0xff]  ;;  %v49_v11 = vld [vmem:[%s3326_s0 + $0x40] sm:$0xff] }
  0x18   :  { %2112 = vmatpush3.bf16.msra.mxu0 %v2109_v3  ;;  %v50_v12 = vld [vmem:[%s3326_s0 + $0x48] sm:$0xff]  ;;  %v51_v13 = vld [vmem:[%s3326_s0 + $0x50] sm:$0xff]  ;;  %v52_v14 = vld [vmem:[%s3326_s0 + $0x58] sm:$0xff] }
  0x19   :  { %v53_v15 = vld [vmem:[%s3326_s0 + $0x60] sm:$0xff]  ;;  %v54_v16 = vld [vmem:[%s3326_s0 + $0x68] sm:$0xff]  ;;  %v55_v17 = vld [vmem:[%s3326_s0 + $0x70] sm:$0xff] }
  0x1a   :  { %v56_v18 = vld [vmem:[%s3326_s0 + $0x78] sm:$0xff]  ;;  %v440_v19 = vld [vmem:[%s3328_s2] sm:$0xff]  ;;  %v441_v20 = vld [vmem:[%s3328_s2 + $0x8] sm:$0xff] }
  0x1b   :  { %2014 = vmatmul.mubr.msk.f32.vlgmr.msra.gmra.mrb[0].mxu0 %vm66_vm0, %v42_v4  ;;  %v2113_v21 = vpack.c.bf16 %v441_v20, %v440_v19  ;;  %v442_v22 = vld [vmem:[%s3328_s2 + $0x10] sm:$0xff]  ;;  %v443_v23 = vld [vmem:[%s3328_s2 + $0x18] sm:$0xff]  ;;  %v2545_v25 = vld [vmem:[%s3331_s5] ss:$0 sm:$0xff] }
  0x1c   :  { %2016 = vmatprep.mubr.msk.f32.mxu0 %vm66_vm0, %v43_v5  ;;  %v2117_v24 = vpack.c.bf16 %v443_v23, %v442_v22 }
  0x1d   :  { %2114 = vmatprep.subr.bf16.mxu1 %v2113_v21 }
  0x1e   :  { %2116 = vmatpush3.bf16.msra.mxu1 %v2113_v21 }
  0x1f   :  { %2017 = vmatmul.mubr.msk.f32.gmra.mrb[2].mxu0 %vm66_vm0, %v44_v6  ;;  %2118 = vmatprep.subr.bf16.mxu1 %v2117_v24 }
  0x20   :  { %2019 = vmatprep.mubr.msk.f32.mxu0 %vm66_vm0, %v45_v7 }
  0x22   :  { %2120 = vmatpush3.bf16.msra.mxu1 %v2117_v24 }
  0x23   :  { %2020 = vmatmul.mubr.msk.f32.gmra.mrb[4].mxu0 %vm66_vm0, %v46_v8 }
  0x24   :  { %2022 = vmatprep.mubr.msk.f32.mxu0 %vm66_vm0, %v47_v9 }
  0x27   :  { %2023 = vmatmul.mubr.msk.f32.gmra.mrb[6].mxu0 %vm66_vm0, %v48_v10 }
  0x28   :  { %2025 = vmatprep.mubr.msk.f32.mxu0 %vm66_vm0, %v49_v11 }
  0x2b   :  { %2026 = vmatmul.mubr.msk.f32.gmra.mrb[8].mxu0 %vm66_vm0, %v50_v12 }
  0x2c   :  { %2028 = vmatprep.mubr.msk.f32.mxu0 %vm66_vm0, %v51_v13 }
  0x2f   :  { %2029 = vmatmul.mubr.msk.f32.gmra.mrb[10].mxu0 %vm66_vm0, %v52_v14 }
  0x30   :  { %2031 = vmatprep.mubr.msk.f32.mxu0 %vm66_vm0, %v53_v15 }
  0x33   :  { %2032 = vmatmul.mubr.msk.f32.gmra.mrb[12].mxu0 %vm66_vm0, %v54_v16 }
  0x34   :  { %2034 = vmatprep.mubr.msk.f32.mxu0 %vm66_vm0, %v55_v17 }
  0x37   :  { %2035 = vmatmul.mubr.msk.f32.gmra.mrb[14].mxu0 %vm66_vm0, %v56_v18 }
  0xee   :  { %v2015_v26 = vpop.f32.mrb[0].mxu0 }
  0xef   :  { %v187_v27 = vadd.f32 %v2015_v26, %v2545_v25  ;;  %v181_v28 = vpop.f32.mrb[1].mxu0 }
  0xf0   :  { %v182_v29 = vadd.f32 %v2545_v25, %v181_v28 }
  0xf1   :  { %v261_v30 = vmul.f32 0.2, %v187_v27 }
  0xf2   :  { %v260_v31 = vmul.f32 0.2, %v182_v29  ;;  %v2018_v32 = vpop.f32.mrb[2].mxu0 }
  0xf3   :  { %v2549_v33 = vmax.f32 %v187_v27, %v261_v30  ;;  %v197_v34 = vadd.f32 %v2018_v32, %v2545_v25  ;;  %v191_v35 = vpop.f32.mrb[3].mxu0 }
  0xf4   :  { %v2552_v36 = vmax.f32 %v182_v29, %v260_v31  ;;  %v192_v37 = vadd.f32 %v2545_v25, %v191_v35 }
  0xf5   :  { %v333_v38 = vmul.f32 %v2549_v33, %v2549_v33  ;;  %v263_v39 = vmul.f32 0.2, %v197_v34  ;;  %v294_v40 = vsel %vm292_vm1, %v2549_v33, 0.0 }
  0xf6   :  { %v293_v41 = vsel %vm292_vm1, %v2552_v36, 0.0  ;;  %v332_v42 = vmul.f32 %v2552_v36, %v2552_v36  ;;  %v262_v43 = vmul.f32 0.2, %v192_v37  ;;  %v2021_v44 = vpop.f32.mrb[4].mxu0 }
  0xf7   :  { %v2563_v45 = vmax.f32 %v197_v34, %v263_v39  ;;  %v207_v46 = vadd.f32 %v2021_v44, %v2545_v25  ;;  %v201_v47 = vpop.f32.mrb[5].mxu0  ;;  %v349_v48 = vsel %vm292_vm1, %v333_v38, 0.0  ;;  %v295_v52 = vadd.f32 %v294_v40, %v293_v41 }
  0xf8   :  { %v348_v49 = vsel %vm292_vm1, %v332_v42, 0.0  ;;  %v2568_v50 = vmax.f32 %v192_v37, %v262_v43  ;;  %v202_v51 = vadd.f32 %v2545_v25, %v201_v47 }
  0xf9   :  { %v335_v53 = vmul.f32 %v2563_v45, %v2563_v45  ;;  %v265_v54 = vmul.f32 0.2, %v207_v46  ;;  %v350_v59 = vadd.f32 %v349_v48, %v348_v49  ;;  %v298_v0 = vsel %vm292_vm1, %v2563_v45, 0.0 }
  0xfa   :  { %v296_v55 = vsel %vm292_vm1, %v2568_v50, 0.0  ;;  %v334_v56 = vmul.f32 %v2568_v50, %v2568_v50  ;;  %v264_v57 = vmul.f32 0.2, %v202_v51  ;;  %v2024_v58 = vpop.f32.mrb[6].mxu0 }
  0xfb   :  { %v297_v60 = vadd.f32 %v296_v55, %v295_v52  ;;  %v2577_v61 = vmax.f32 %v207_v46, %v265_v54  ;;  %v217_v62 = vadd.f32 %v2024_v58, %v2545_v25  ;;  %v211_v63 = vpop.f32.mrb[7].mxu0  ;;  %v353_v4 = vsel %vm292_vm1, %v335_v53, 0.0 }
  0xfc   :  { %v351_v1 = vsel %vm292_vm1, %v334_v56, 0.0  ;;  %v2583_v2 = vmax.f32 %v202_v51, %v264_v57  ;;  %v212_v3 = vadd.f32 %v2545_v25, %v211_v63 }
  0xfd   :  { %v352_v5 = vadd.f32 %v351_v1, %v350_v59  ;;  %v337_v6 = vmul.f32 %v2577_v61, %v2577_v61  ;;  %v299_v7 = vadd.f32 %v298_v0, %v297_v60  ;;  %v267_v10 = vmul.f32 0.2, %v217_v62 }
  0xfe   :  { %v300_v8 = vsel %vm292_vm1, %v2583_v2, 0.0  ;;  %v336_v9 = vmul.f32 %v2583_v2, %v2583_v2  ;;  %v266_v11 = vmul.f32 0.2, %v212_v3  ;;  %v2027_v12 = vpop.f32.mrb[8].mxu0  ;;  %v302_v13 = vsel %vm292_vm1, %v2577_v61, 0.0 }
  0xff   :  { %v301_v14 = vadd.f32 %v300_v8, %v299_v7  ;;  %v354_v15 = vadd.f32 %v353_v4, %v352_v5  ;;  %v227_v16 = vadd.f32 %v2027_v12, %v2545_v25  ;;  %v221_v17 = vpop.f32.mrb[9].mxu0  ;;  %v2597_v19 = vmax.f32 %v217_v62, %v267_v10 }
 0x100   :  { %v355_v18 = vsel %vm292_vm1, %v336_v9, 0.0  ;;  %v2599_v20 = vmax.f32 %v212_v3, %v266_v11  ;;  %v222_v21 = vadd.f32 %v2545_v25, %v221_v17  ;;  %v357_v26 = vsel %vm292_vm1, %v337_v6, 0.0 }
 0x101   :  { %v356_v22 = vadd.f32 %v355_v18, %v354_v15  ;;  %v303_v23 = vadd.f32 %v302_v13, %v301_v14  ;;  %v269_v24 = vmul.f32 0.2, %v227_v16  ;;  %v339_v27 = vmul.f32 %v2597_v19, %v2597_v19 }
 0x102   :  { %v304_v28 = vsel %vm292_vm1, %v2599_v20, 0.0  ;;  %v338_v29 = vmul.f32 %v2599_v20, %v2599_v20  ;;  %v2030_v30 = vpop.f32.mrb[10].mxu0  ;;  %v268_v35 = vmul.f32 0.2, %v222_v21  ;;  %v306_v41 = vsel %vm292_vm1, %v2597_v19, 0.0 }
 0x103   :  { %v305_v31 = vadd.f32 %v304_v28, %v303_v23  ;;  %v358_v32 = vadd.f32 %v357_v26, %v356_v22  ;;  %v2609_v34 = vmax.f32 %v227_v16, %v269_v24  ;;  %v231_v37 = vpop.f32.mrb[11].mxu0  ;;  %v237_v39 = vadd.f32 %v2030_v30, %v2545_v25 }
 0x104   :  { %v359_v38 = vsel %vm292_vm1, %v338_v29, 0.0  ;;  %v232_v40 = vadd.f32 %v2545_v25, %v231_v37  ;;  %v361_v42 = vsel %vm292_vm1, %v339_v27, 0.0  ;;  %v2617_v44 = vmax.f32 %v222_v21, %v268_v35 }
 0x105   :  { %v360_v43 = vadd.f32 %v359_v38, %v358_v32  ;;  %v341_v46 = vmul.f32 %v2609_v34, %v2609_v34  ;;  %v307_v47 = vadd.f32 %v306_v41, %v305_v31  ;;  %v271_v48 = vmul.f32 0.2, %v237_v39 }
 0x106   :  { %v270_v49 = vmul.f32 0.2, %v232_v40  ;;  %v2033_v51 = vpop.f32.mrb[12].mxu0  ;;  %v308_v52 = vsel %vm292_vm1, %v2617_v44, 0.0  ;;  %v340_v53 = vmul.f32 %v2617_v44, %v2617_v44  ;;  %v310_v60 = vsel %vm292_vm1, %v2609_v34, 0.0 }
 0x107   :  { %v362_v54 = vadd.f32 %v361_v42, %v360_v43  ;;  %v241_v55 = vpop.f32.mrb[13].mxu0  ;;  %v309_v56 = vadd.f32 %v308_v52, %v307_v47  ;;  %v2625_v57 = vmax.f32 %v237_v39, %v271_v48  ;;  %v247_v59 = vadd.f32 %v2033_v51, %v2545_v25 }
 0x108   :  { %v2627_v58 = vmax.f32 %v232_v40, %v270_v49  ;;  %v363_v62 = vsel %vm292_vm1, %v340_v53, 0.0  ;;  %v242_v63 = vadd.f32 %v2545_v25, %v241_v55  ;;  %v365_v0 = vsel %vm292_vm1, %v341_v46, 0.0 }
 0x109   :  { %v364_v1 = vadd.f32 %v363_v62, %v362_v54  ;;  %v343_v3 = vmul.f32 %v2625_v57, %v2625_v57  ;;  %v311_v4 = vadd.f32 %v310_v60, %v309_v56  ;;  %v273_v8 = vmul.f32 0.2, %v247_v59 }
 0x10a   :  { %v2036_v5 = vpop.f32.mrb[14].mxu0  ;;  %v312_v6 = vsel %vm292_vm1, %v2627_v58, 0.0  ;;  %v342_v7 = vmul.f32 %v2627_v58, %v2627_v58  ;;  %v272_v9 = vmul.f32 0.2, %v242_v63  ;;  %v314_v11 = vsel %vm292_vm1, %v2625_v57, 0.0 }
 0x10b   :  { %v251_v10 = vpop.f32.mrb[15].mxu0  ;;  %v313_v12 = vadd.f32 %v312_v6, %v311_v4  ;;  %v366_v13 = vadd.f32 %v365_v0, %v364_v1  ;;  %v257_v14 = vadd.f32 %v2036_v5, %v2545_v25  ;;  %v2645_v16 = vmax.f32 %v247_v59, %v273_v8 }
 0x10c   :  { %v367_v15 = vsel %vm292_vm1, %v342_v7, 0.0  ;;  %v2647_v17 = vmax.f32 %v242_v63, %v272_v9  ;;  %v252_v18 = vadd.f32 %v2545_v25, %v251_v10  ;;  %v369_v24 = vsel %vm292_vm1, %v343_v3, 0.0 }
 0x10d   :  { %v368_v21 = vadd.f32 %v367_v15, %v366_v13  ;;  %v315_v22 = vadd.f32 %v314_v11, %v313_v12  ;;  %v275_v23 = vmul.f32 0.2, %v257_v14  ;;  %v345_v26 = vmul.f32 %v2645_v16, %v2645_v16  ;;  %v389_v15 = vld [vmem:[%s3331_s5 + $0x1] sm:$0x1] }
 0x10e   :  { %v316_v27 = vsel %vm292_vm1, %v2647_v17, 0.0  ;;  %v344_v28 = vmul.f32 %v2647_v17, %v2647_v17  ;;  %v274_v32 = vmul.f32 0.2, %v252_v18  ;;  %v318_v35 = vsel %vm292_vm1, %v2645_v16, 0.0 }
 0x10f   :  { %v317_v29 = vadd.f32 %v316_v27, %v315_v22  ;;  %v370_v30 = vadd.f32 %v369_v24, %v368_v21  ;;  %v2657_v31 = vmax.f32 %v257_v14, %v275_v23  ;;  %v373_v39 = vsel %vm292_vm1, %v345_v26, 0.0  ;;  %v393_v23 = vld [vmem:[%s3331_s5 + $0x2] sm:$0x1] }
 0x110   :  { %v371_v25 = vsel %vm292_vm1, %v344_v28, 0.0  ;;  %v290_v38 = vmax.f32 %v252_v18, %v274_v32  ;;  %v397_v13 = vlaneseq }
 0x111   :  { %v372_v37 = vadd.f32 %v371_v25, %v370_v30  ;;  %v319_v40 = vadd.f32 %v318_v35, %v317_v29  ;;  %v347_v41 = vmul.f32 %v2657_v31, %v2657_v31  ;;  %v322_v48 = vsel %vm292_vm1, %v2657_v31, 0.0 }
 0x112   :  { %v320_v42 = vsel %vm292_vm1, %v290_v38, 0.0  ;;  %v346_v43 = vmul.f32 %v290_v38, %v290_v38  ;;  %v2671_v14 = vshrl.u32 %v397_v13, 7  ;;  %vm1446_vm3 = vcmp.lt.s32.totalorder %v397_v13, 256 }
 0x113   :  { %v374_v46 = vadd.f32 %v373_v39, %v372_v37  ;;  %v321_v47 = vadd.f32 %v320_v42, %v319_v40  ;;  %v377_v53 = vsel %vm292_vm1, %v347_v41, 0.0 }
 0x114   :  { %v375_v49 = vsel %vm292_vm1, %v346_v43, 0.0  ;;  %v2677_v18 = vsub.s32 0, %v2671_v14 }
 0x115   :  { %v323_v51 = vadd.f32 %v322_v48, %v321_v47  ;;  %v376_v52 = vadd.f32 %v375_v49, %v374_v46 }
 0x117   :  { %v324_v54 = vrot.slane %v323_v51, 4  ;;  %v378_v55 = vadd.f32 %v377_v53, %v376_v52 }
 0x119   :  { %v325_v56 = vadd.f32 %v324_v54, %v323_v51  ;;  %v379_v59 = vrot.slane %v378_v55, 4 }
 0x11b   :  { %v326_v60 = vrot.slane %v325_v56, 2  ;;  %v380_v62 = vadd.f32 %v379_v59, %v378_v55  ;;  %v825_v55 = vld [vmem:[%s3329_s3 + $0x10] sm:$0xff] }
 0x11d   :  { %v327_v63 = vadd.f32 %v326_v60, %v325_v56  ;;  %v381_v0 = vrot.slane %v380_v62, 2  ;;  %v826_v56 = vld [vmem:[%s3329_s3 + $0x18] sm:$0xff]  ;;  %v827_v60 = vld [vmem:[%s3329_s3 + $0x20] sm:$0xff] }
 0x11e   :  { %v2125_v59 = vpack.c.bf16 %v826_v56, %v825_v55 }
 0x11f   :  { %v328_v1 = vrot.slane %v327_v63, 1  ;;  %v382_v3 = vadd.f32 %v381_v0, %v380_v62  ;;  %v828_v62 = vld [vmem:[%s3329_s3 + $0x28] sm:$0xff]  ;;  %v829_v0 = vld [vmem:[%s3329_s3 + $0x30] sm:$0xff] }
 0x121   :  { %v329_v4 = vadd.f32 %v328_v1, %v327_v63  ;;  %v383_v5 = vrot.slane %v382_v3, 1  ;;  %v2129_v63 = vpack.c.bf16 %v828_v62, %v827_v60  ;;  %v830_v1 = vld [vmem:[%s3329_s3 + $0x38] sm:$0xff] }
 0x123   :  { %v331_v6 = vmul.f32 0.0078125, %v329_v4  ;;  %v384_v7 = vadd.f32 %v383_v5, %v382_v3  ;;  %v2133_v3 = vpack.c.bf16 %v830_v1, %v829_v0  ;;  %v2742_v4 = vld [vmem:[%s3331_s5 + $0x3] ss:$0 sm:$0xff] }
 0x125   :  { %v385_v8 = vmul.f32 0.0078125, %v384_v7  ;;  %v386_v9 = vmul.f32 %v331_v6, %v331_v6 }
 0x127   :  { %v387_v10 = vsub.f32 %v385_v8, %v386_v9 }
 0x129   :  { %v388_v11 = vmax.f32 %v387_v10, 0.0 }
 0x12b   :  { %v390_v12 = vadd.f32 1e-05, %v388_v11 }
 0x12d   :  { %2192 = vrsqrt.f32 %v390_v12 }
 0x137   :  { %v2193_v21 = vpop.eup %2192 }
 0x138   :  { %v392_v22 = vmul.f32 %v2193_v21, %v389_v15 }
 0x13a   :  { %v394_v24 = vmul.f32 %v392_v22, %v331_v6  ;;  %v400_v26 = vrot.slane %v392_v22, %v2677_v18 }
 0x13c   :  { %v395_v27 = vsub.f32 %v393_v23, %v394_v24  ;;  %v416_v28 = vmul.f32 %v400_v26, %v290_v38  ;;  %v402_v29 = vmul.f32 %v400_v26, %v2552_v36  ;;  %v403_v30 = vmul.f32 %v400_v26, %v2549_v33 }
 0x13d   :  { %v404_v32 = vmul.f32 %v400_v26, %v2568_v50  ;;  %v405_v25 = vmul.f32 %v400_v26, %v2563_v45  ;;  %v406_v35 = vmul.f32 %v400_v26, %v2583_v2  ;;  %v407_v37 = vmul.f32 %v400_v26, %v2577_v61 }
 0x13e   :  { %v422_v39 = vrot.slane %v395_v27, %v2677_v18  ;;  %v408_v40 = vmul.f32 %v400_v26, %v2599_v20  ;;  %v409_v41 = vmul.f32 %v400_v26, %v2597_v19  ;;  %v410_v38 = vmul.f32 %v400_v26, %v2617_v44 }
 0x13f   :  { %v411_v36 = vmul.f32 %v400_v26, %v2609_v34  ;;  %v412_v33 = vmul.f32 %v400_v26, %v2627_v58  ;;  %v413_v50 = vmul.f32 %v400_v26, %v2625_v57  ;;  %v414_v45 = vmul.f32 %v400_v26, %v2647_v17 }
 0x140   :  { %v424_v42 = vadd.f32 %v422_v39, %v402_v29  ;;  %v425_v2 = vadd.f32 %v422_v39, %v403_v30  ;;  %v426_v43 = vadd.f32 %v422_v39, %v404_v32  ;;  %v427_v61 = vadd.f32 %v422_v39, %v405_v25 }
 0x141   :  { %v428_v46 = vadd.f32 %v422_v39, %v406_v35  ;;  %v429_v47 = vadd.f32 %v422_v39, %v407_v37  ;;  %v430_v48 = vadd.f32 %v422_v39, %v408_v40  ;;  %v431_v20 = vadd.f32 %v422_v39, %v409_v41 }
 0x142   :  { %2045 = vmatprep.mubr.msk.f32.mxu1 %vm292_vm1, %v424_v42  ;;  %v432_v19 = vadd.f32 %v422_v39, %v410_v38  ;;  %v433_v44 = vadd.f32 %v422_v39, %v411_v36  ;;  %v434_v49 = vadd.f32 %v422_v39, %v412_v33  ;;  %v435_v34 = vadd.f32 %v422_v39, %v413_v50 }
 0x143   :  { %2046 = vmatmul.mubr.msk.f32.vlgmr.msra.gmra.mrb[0].mxu1 %vm292_vm1, %v425_v2  ;;  %v436_v58 = vadd.f32 %v422_v39, %v414_v45  ;;  %v415_v57 = vmul.f32 %v400_v26, %v2645_v16  ;;  %v438_v17 = vadd.f32 %v422_v39, %v416_v28  ;;  %v417_v51 = vmul.f32 %v400_v26, %v2657_v31  ;;  %v823_v16 = vld [vmem:[%s3329_s3] sm:$0xff]  ;;  %v824_v31 = vld [vmem:[%s3329_s3 + $0x8] sm:$0xff] }
 0x144   :  { %2048 = vmatprep.mubr.msk.f32.mxu1 %vm292_vm1, %v426_v43  ;;  %v2121_v54 = vpack.c.bf16 %v824_v31, %v823_v16 }
 0x145   :  { %v437_v52 = vadd.f32 %v422_v39, %v415_v57  ;;  %v439_v53 = vadd.f32 %v422_v39, %v417_v51 }
 0x146   :  { %2122 = vmatprep.subr.bf16.mxu0 %v2121_v54 }
 0x147   :  { %2049 = vmatmul.mubr.msk.f32.gmra.mrb[2].mxu1 %vm292_vm1, %v427_v61  ;;  %2124 = vmatpush3.bf16.msra.mxu0 %v2121_v54 }
 0x148   :  { %2051 = vmatprep.mubr.msk.f32.mxu1 %vm292_vm1, %v428_v46  ;;  %2126 = vmatprep.subr.bf16.mxu0 %v2125_v59 }
 0x14b   :  { %2052 = vmatmul.mubr.msk.f32.gmra.mrb[4].mxu1 %vm292_vm1, %v429_v47  ;;  %2128 = vmatpush3.bf16.msra.mxu0 %v2125_v59 }
 0x14c   :  { %2054 = vmatprep.mubr.msk.f32.mxu1 %vm292_vm1, %v430_v48  ;;  %2130 = vmatprep.subr.bf16.mxu0 %v2129_v63 }
 0x14f   :  { %2055 = vmatmul.mubr.msk.f32.gmra.mrb[6].mxu1 %vm292_vm1, %v431_v20  ;;  %2132 = vmatpush3.bf16.msra.mxu0 %v2129_v63 }
 0x150   :  { %2057 = vmatprep.mubr.msk.f32.mxu1 %vm292_vm1, %v432_v19  ;;  %2134 = vmatprep.subr.bf16.mxu0 %v2133_v3 }
 0x153   :  { %2058 = vmatmul.mubr.msk.f32.gmra.mrb[8].mxu1 %vm292_vm1, %v433_v44  ;;  %2136 = vmatpush3.bf16.msra.mxu0 %v2133_v3 }
 0x154   :  { %2060 = vmatprep.mubr.msk.f32.mxu1 %vm292_vm1, %v434_v49 }
 0x157   :  { %2061 = vmatmul.mubr.msk.f32.gmra.mrb[10].mxu1 %vm292_vm1, %v435_v34 }
 0x158   :  { %2063 = vmatprep.mubr.msk.f32.mxu1 %vm292_vm1, %v436_v58 }
 0x15b   :  { %2064 = vmatmul.mubr.msk.f32.gmra.mrb[12].mxu1 %vm292_vm1, %v437_v52 }
 0x15c   :  { %2066 = vmatprep.mubr.msk.f32.mxu1 %vm292_vm1, %v438_v17 }
 0x15f   :  { %2067 = vmatmul.mubr.msk.f32.gmra.mrb[14].mxu1 %vm292_vm1, %v439_v53 }
 0x216   :  { %v2047_v5 = vpop.f32.mrb[0].mxu1 }
 0x217   :  { %v571_v6 = vadd.f32 %v2047_v5, %v2742_v4  ;;  %v565_v7 = vpop.f32.mrb[1].mxu1 }
 0x218   :  { %v566_v8 = vadd.f32 %v2742_v4, %v565_v7 }
 0x219   :  { %v645_v9 = vmul.f32 0.2, %v571_v6 }
 0x21a   :  { %v644_v10 = vmul.f32 0.2, %v566_v8  ;;  %v2050_v11 = vpop.f32.mrb[2].mxu1 }
 0x21b   :  { %v2746_v12 = vmax.f32 %v571_v6, %v645_v9  ;;  %v581_v15 = vadd.f32 %v2050_v11, %v2742_v4  ;;  %v575_v21 = vpop.f32.mrb[3].mxu1 }
 0x21c   :  { %v2749_v22 = vmax.f32 %v566_v8, %v644_v10  ;;  %v576_v23 = vadd.f32 %v2742_v4, %v575_v21 }
 0x21d   :  { %v716_v24 = vmul.f32 %v2746_v12, %v2746_v12  ;;  %v647_v26 = vmul.f32 0.2, %v581_v15  ;;  %v678_v27 = vsel %vm676_vm2, %v2746_v12, 0.0 }
 0x21e   :  { %v677_v28 = vsel %vm676_vm2, %v2749_v22, 0.0  ;;  %v715_v29 = vmul.f32 %v2749_v22, %v2749_v22  ;;  %v646_v30 = vmul.f32 0.2, %v576_v23  ;;  %v2053_v32 = vpop.f32.mrb[4].mxu1 }
 0x21f   :  { %v2760_v25 = vmax.f32 %v581_v15, %v647_v26  ;;  %v591_v35 = vadd.f32 %v2053_v32, %v2742_v4  ;;  %v585_v37 = vpop.f32.mrb[5].mxu1  ;;  %v732_v39 = vsel %vm676_vm2, %v716_v24, 0.0  ;;  %v679_v36 = vadd.f32 %v678_v27, %v677_v28 }
 0x220   :  { %v731_v40 = vsel %vm676_vm2, %v715_v29, 0.0  ;;  %v2765_v41 = vmax.f32 %v576_v23, %v646_v30  ;;  %v586_v38 = vadd.f32 %v2742_v4, %v585_v37 }
 0x221   :  { %v718_v33 = vmul.f32 %v2760_v25, %v2760_v25  ;;  %v649_v50 = vmul.f32 0.2, %v591_v35  ;;  %v733_v61 = vadd.f32 %v732_v39, %v731_v40  ;;  %v682_v19 = vsel %vm676_vm2, %v2760_v25, 0.0 }
 0x222   :  { %v680_v45 = vsel %vm676_vm2, %v2765_v41, 0.0  ;;  %v717_v42 = vmul.f32 %v2765_v41, %v2765_v41  ;;  %v648_v2 = vmul.f32 0.2, %v586_v38  ;;  %v2056_v43 = vpop.f32.mrb[6].mxu1 }
 0x223   :  { %v681_v46 = vadd.f32 %v680_v45, %v679_v36  ;;  %v2774_v47 = vmax.f32 %v591_v35, %v649_v50  ;;  %v601_v48 = vadd.f32 %v2056_v43, %v2742_v4  ;;  %v595_v20 = vpop.f32.mrb[7].mxu1  ;;  %v736_v58 = vsel %vm676_vm2, %v718_v33, 0.0 }
 0x224   :  { %v734_v44 = vsel %vm676_vm2, %v717_v42, 0.0  ;;  %v2780_v49 = vmax.f32 %v586_v38, %v648_v2  ;;  %v596_v34 = vadd.f32 %v2742_v4, %v595_v20 }
 0x225   :  { %v735_v57 = vadd.f32 %v734_v44, %v733_v61  ;;  %v720_v17 = vmul.f32 %v2774_v47, %v2774_v47  ;;  %v683_v51 = vadd.f32 %v682_v19, %v681_v46  ;;  %v651_v16 = vmul.f32 0.2, %v601_v48 }
 0x226   :  { %v684_v52 = vsel %vm676_vm2, %v2780_v49, 0.0  ;;  %v719_v53 = vmul.f32 %v2780_v49, %v2780_v49  ;;  %v650_v31 = vmul.f32 0.2, %v596_v34  ;;  %v2059_v54 = vpop.f32.mrb[8].mxu1  ;;  %v686_v55 = vsel %vm676_vm2, %v2774_v47, 0.0 }
 0x227   :  { %v685_v56 = vadd.f32 %v684_v52, %v683_v51  ;;  %v737_v59 = vadd.f32 %v736_v58, %v735_v57  ;;  %v611_v60 = vadd.f32 %v2059_v54, %v2742_v4  ;;  %v605_v62 = vpop.f32.mrb[9].mxu1  ;;  %v2794_v0 = vmax.f32 %v601_v48, %v651_v16 }
 0x228   :  { %v738_v63 = vsel %vm676_vm2, %v719_v53, 0.0  ;;  %v2796_v1 = vmax.f32 %v596_v34, %v650_v31  ;;  %v606_v3 = vadd.f32 %v2742_v4, %v605_v62  ;;  %v740_v8 = vsel %vm676_vm2, %v720_v17, 0.0 }
 0x229   :  { %v739_v5 = vadd.f32 %v738_v63, %v737_v59  ;;  %v687_v6 = vadd.f32 %v686_v55, %v685_v56  ;;  %v653_v7 = vmul.f32 0.2, %v611_v60  ;;  %v722_v9 = vmul.f32 %v2794_v0, %v2794_v0 }
 0x22a   :  { %v688_v10 = vsel %vm676_vm2, %v2796_v1, 0.0  ;;  %v721_v11 = vmul.f32 %v2796_v1, %v2796_v1  ;;  %v2062_v15 = vpop.f32.mrb[10].mxu1  ;;  %v652_v26 = vmul.f32 0.2, %v606_v3  ;;  %v690_v32 = vsel %vm676_vm2, %v2794_v0, 0.0 }
 0x22b   :  { %v689_v21 = vadd.f32 %v688_v10, %v687_v6  ;;  %v741_v23 = vadd.f32 %v740_v8, %v739_v5  ;;  %v2806_v24 = vmax.f32 %v611_v60, %v653_v7  ;;  %v615_v27 = vpop.f32.mrb[11].mxu1  ;;  %v621_v29 = vadd.f32 %v2062_v15, %v2742_v4 }
 0x22c   :  { %v742_v28 = vsel %vm676_vm2, %v721_v11, 0.0  ;;  %v616_v30 = vadd.f32 %v2742_v4, %v615_v27  ;;  %v744_v35 = vsel %vm676_vm2, %v722_v9, 0.0  ;;  %v2814_v39 = vmax.f32 %v606_v3, %v652_v26 }
 0x22d   :  { %v743_v37 = vadd.f32 %v742_v28, %v741_v23  ;;  %v724_v40 = vmul.f32 %v2806_v24, %v2806_v24  ;;  %v691_v38 = vadd.f32 %v690_v32, %v689_v21  ;;  %v655_v36 = vmul.f32 0.2, %v621_v29 }
 0x22e   :  { %v654_v33 = vmul.f32 0.2, %v616_v30  ;;  %v2065_v50 = vpop.f32.mrb[12].mxu1  ;;  %v692_v45 = vsel %vm676_vm2, %v2814_v39, 0.0  ;;  %v723_v42 = vmul.f32 %v2814_v39, %v2814_v39  ;;  %v694_v19 = vsel %vm676_vm2, %v2806_v24, 0.0 }
 0x22f   :  { %v745_v2 = vadd.f32 %v744_v35, %v743_v37  ;;  %v625_v43 = vpop.f32.mrb[13].mxu1  ;;  %v693_v61 = vadd.f32 %v692_v45, %v691_v38  ;;  %v2822_v46 = vmax.f32 %v621_v29, %v655_v36  ;;  %v631_v20 = vadd.f32 %v2065_v50, %v2742_v4 }
 0x230   :  { %v2824_v48 = vmax.f32 %v616_v30, %v654_v33  ;;  %v746_v44 = vsel %vm676_vm2, %v723_v42, 0.0  ;;  %v626_v34 = vadd.f32 %v2742_v4, %v625_v43  ;;  %v748_v58 = vsel %vm676_vm2, %v724_v40, 0.0 }
 0x231   :  { %v747_v57 = vadd.f32 %v746_v44, %v745_v2  ;;  %v726_v17 = vmul.f32 %v2822_v46, %v2822_v46  ;;  %v695_v51 = vadd.f32 %v694_v19, %v693_v61  ;;  %v657_v31 = vmul.f32 0.2, %v631_v20 }
 0x232   :  { %v2068_v52 = vpop.f32.mrb[14].mxu1  ;;  %v696_v53 = vsel %vm676_vm2, %v2824_v48, 0.0  ;;  %v725_v16 = vmul.f32 %v2824_v48, %v2824_v48  ;;  %v656_v54 = vmul.f32 0.2, %v626_v34  ;;  %v698_v56 = vsel %vm676_vm2, %v2822_v46, 0.0 }
 0x233   :  { %v635_v55 = vpop.f32.mrb[15].mxu1  ;;  %v697_v59 = vadd.f32 %v696_v53, %v695_v51  ;;  %v749_v60 = vadd.f32 %v748_v58, %v747_v57  ;;  %v641_v62 = vadd.f32 %v2068_v52, %v2742_v4  ;;  %v2842_v3 = vmax.f32 %v631_v20, %v657_v31 }
 0x234   :  { %v750_v63 = vsel %vm676_vm2, %v725_v16, 0.0  ;;  %v2844_v5 = vmax.f32 %v626_v34, %v656_v54  ;;  %v636_v6 = vadd.f32 %v2742_v4, %v635_v55  ;;  %v752_v10 = vsel %vm676_vm2, %v726_v17, 0.0 }
 0x235   :  { %v751_v7 = vadd.f32 %v750_v63, %v749_v60  ;;  %v699_v8 = vadd.f32 %v698_v56, %v697_v59  ;;  %v659_v9 = vmul.f32 0.2, %v641_v62  ;;  %v728_v11 = vmul.f32 %v2842_v3, %v2842_v3 }
 0x236   :  { %v700_v15 = vsel %vm676_vm2, %v2844_v5, 0.0  ;;  %v727_v21 = vmul.f32 %v2844_v5, %v2844_v5  ;;  %v658_v28 = vmul.f32 0.2, %v636_v6  ;;  %v702_v29 = vsel %vm676_vm2, %v2842_v3, 0.0 }
 0x237   :  { %v701_v23 = vadd.f32 %v700_v15, %v699_v8  ;;  %v753_v26 = vadd.f32 %v752_v10, %v751_v7  ;;  %v2854_v27 = vmax.f32 %v641_v62, %v659_v9  ;;  %v756_v35 = vsel %vm676_vm2, %v728_v11, 0.0  ;;  %v776_v9 = vld [vmem:[%s3331_s5 + $0x5] sm:$0x1] }
 0x238   :  { %v754_v4 = vsel %vm676_vm2, %v727_v21, 0.0  ;;  %v674_v32 = vmax.f32 %v636_v6, %v658_v28  ;;  %v772_v6 = vld [vmem:[%s3331_s5 + $0x4] sm:$0x1] }
 0x239   :  { %v755_v30 = vadd.f32 %v754_v4, %v753_v26  ;;  %v703_v37 = vadd.f32 %v702_v29, %v701_v23  ;;  %v730_v40 = vmul.f32 %v2854_v27, %v2854_v27  ;;  %v706_v45 = vsel %vm676_vm2, %v2854_v27, 0.0 }
 0x23a   :  { %v704_v38 = vsel %vm676_vm2, %v674_v32, 0.0  ;;  %v729_v36 = vmul.f32 %v674_v32, %v674_v32 }
 0x23b   :  { %v757_v33 = vadd.f32 %v756_v35, %v755_v30  ;;  %v705_v50 = vadd.f32 %v704_v38, %v703_v37  ;;  %v760_v61 = vsel %vm676_vm2, %v730_v40, 0.0 }
 0x23c   :  { %v758_v42 = vsel %vm676_vm2, %v729_v36, 0.0 }
 0x23d   :  { %v707_v2 = vadd.f32 %v706_v45, %v705_v50  ;;  %v759_v43 = vadd.f32 %v758_v42, %v757_v33 }
 0x23f   :  { %v708_v20 = vrot.slane %v707_v2, 4  ;;  %v761_v19 = vadd.f32 %v760_v61, %v759_v43 }
 0x241   :  { %v709_v44 = vadd.f32 %v708_v20, %v707_v2  ;;  %v762_v34 = vrot.slane %v761_v19, 4 }
 0x243   :  { %v710_v58 = vrot.slane %v709_v44, 2  ;;  %v763_v57 = vadd.f32 %v762_v34, %v761_v19  ;;  %v1177_v19 = vld [vmem:[#allocation2] sm:$0xff] }
 0x245   :  { %v711_v17 = vadd.f32 %v710_v58, %v709_v44  ;;  %v764_v51 = vrot.slane %v763_v57, 2  ;;  %v1179_v44 = vld [vmem:[#allocation2 + $0x10] sm:$0xff]  ;;  %v1182_v58 = vld [vmem:[#allocation2 + $0x28] sm:$0xff] }
 0x246   :  { %v2139_v34 = vpack.c.bf16 %v1179_v44, %v1177_v19 }
 0x247   :  { %v712_v52 = vrot.slane %v711_v17, 1  ;;  %v765_v53 = vadd.f32 %v764_v51, %v763_v57  ;;  %v1184_v57 = vld [vmem:[#allocation2 + $0x38] sm:$0xff]  ;;  %v1181_v51 = vld [vmem:[#allocation2 + $0x20] sm:$0xff] }
 0x249   :  { %v713_v16 = vadd.f32 %v712_v52, %v711_v17  ;;  %v766_v31 = vrot.slane %v765_v53, 1  ;;  %v2141_v17 = vpack.c.bf16 %v1184_v57, %v1182_v58  ;;  %v1183_v52 = vld [vmem:[#allocation2 + $0x30] sm:$0xff] }
 0x24b   :  { %v714_v54 = vmul.f32 0.0078125, %v713_v16  ;;  %v767_v55 = vadd.f32 %v766_v31, %v765_v53  ;;  %v2143_v53 = vpack.c.bf16 %v1183_v52, %v1181_v51  ;;  %v1186_v16 = vld [vmem:[#allocation2 + $0x48] sm:$0xff]  ;;  %v1188_v31 = vld [vmem:[#allocation2 + $0x58] sm:$0xff] }
 0x24d   :  { %v768_v56 = vmul.f32 0.0078125, %v767_v55  ;;  %v769_v59 = vmul.f32 %v714_v54, %v714_v54  ;;  %v1185_v55 = vld [vmem:[#allocation2 + $0x40] sm:$0xff] }
 0x24f   :  { %v770_v60 = vsub.f32 %v768_v56, %v769_v59  ;;  %v1187_v56 = vld [vmem:[#allocation2 + $0x50] sm:$0xff] }
 0x250   :  { %v2147_v59 = vpack.c.bf16 %v1187_v56, %v1185_v55 }
 0x251   :  { %v771_v62 = vmax.f32 %v770_v60, 0.0  ;;  %v1190_v60 = vld [vmem:[#allocation2 + $0x68] sm:$0xff] }
 0x253   :  { %v773_v63 = vadd.f32 1e-05, %v771_v62  ;;  %v1192_v62 = vld [vmem:[#allocation2 + $0x78] sm:$0xff] }
 0x255   :  { %2194 = vrsqrt.f32 %v773_v63  ;;  %v2149_v63 = vpack.c.bf16 %v1192_v62, %v1190_v60 }
 0x25f   :  { %v2195_v7 = vpop.eup %2194 }
 0x260   :  { %v775_v8 = vmul.f32 %v2195_v7, %v772_v6  ;;  %v1189_v6 = vld [vmem:[#allocation2 + $0x60] sm:$0xff]  ;;  %v1191_v7 = vld [vmem:[#allocation2 + $0x70] sm:$0xff] }
 0x262   :  { %v777_v10 = vmul.f32 %v775_v8, %v714_v54  ;;  %v783_v11 = vrot.slane %v775_v8, %v2677_v18  ;;  %v2145_v54 = vpack.c.bf16 %v1188_v31, %v1186_v16  ;;  %v2151_v8 = vpack.c.bf16 %v1191_v7, %v1189_v6 }
 0x264   :  { %v778_v15 = vsub.f32 %v776_v9, %v777_v10  ;;  %v799_v21 = vmul.f32 %v783_v11, %v674_v32  ;;  %v785_v23 = vmul.f32 %v783_v11, %v2749_v22  ;;  %v786_v26 = vmul.f32 %v783_v11, %v2746_v12  ;;  %v1194_v9 = vld [vmem:[#allocation2 + $0x88] sm:$0xff]  ;;  %v1196_v10 = vld [vmem:[#allocation2 + $0x98] sm:$0xff] }
 0x265   :  { %v787_v28 = vmul.f32 %v783_v11, %v2765_v41  ;;  %v788_v4 = vmul.f32 %v783_v11, %v2760_v25  ;;  %v789_v29 = vmul.f32 %v783_v11, %v2780_v49  ;;  %v790_v30 = vmul.f32 %v783_v11, %v2774_v47 }
 0x266   :  { %v805_v35 = vrot.slane %v778_v15, %v2677_v18  ;;  %v791_v37 = vmul.f32 %v783_v11, %v2796_v1  ;;  %v792_v40 = vmul.f32 %v783_v11, %v2794_v0  ;;  %v793_v32 = vmul.f32 %v783_v11, %v2814_v39  ;;  %v1193_v15 = vld [vmem:[#allocation2 + $0x80] sm:$0xff] }
 0x267   :  { %v794_v22 = vmul.f32 %v783_v11, %v2806_v24  ;;  %v795_v12 = vmul.f32 %v783_v11, %v2824_v48  ;;  %v796_v41 = vmul.f32 %v783_v11, %v2822_v46  ;;  %v797_v25 = vmul.f32 %v783_v11, %v2844_v5 }
 0x268   :  { %v807_v38 = vadd.f32 %v805_v35, %v785_v23  ;;  %v808_v49 = vadd.f32 %v805_v35, %v786_v26  ;;  %v809_v36 = vadd.f32 %v805_v35, %v787_v28  ;;  %v810_v47 = vadd.f32 %v805_v35, %v788_v4  ;;  %v1198_v26 = vld [vmem:[#allocation2 + $0xa8] sm:$0xff]  ;;  %v1200_v28 = vld [vmem:[#allocation2 + $0xb8] sm:$0xff] }
 0x269   :  { %v811_v33 = vadd.f32 %v805_v35, %v789_v29  ;;  %v812_v50 = vadd.f32 %v805_v35, %v790_v30  ;;  %v813_v45 = vadd.f32 %v805_v35, %v791_v37  ;;  %v814_v1 = vadd.f32 %v805_v35, %v792_v40  ;;  %v1197_v29 = vld [vmem:[#allocation2 + $0xa0] sm:$0xff]  ;;  %v1199_v30 = vld [vmem:[#allocation2 + $0xb0] sm:$0xff]  ;;  %v1202_v37 = vld [vmem:[#allocation2 + $0xc8] sm:$0xff] }
 0x26a   :  { %2085 = vmatprep.mubr.msk.f32.mxu0 %vm676_vm2, %v807_v38  ;;  %v815_v0 = vadd.f32 %v805_v35, %v793_v32  ;;  %v816_v39 = vadd.f32 %v805_v35, %v794_v22  ;;  %v817_v42 = vadd.f32 %v805_v35, %v795_v12  ;;  %v818_v24 = vadd.f32 %v805_v35, %v796_v41  ;;  %v1204_v40 = vld [vmem:[#allocation2 + $0xd8] sm:$0xff]  ;;  %v1201_v32 = vld [vmem:[#allocation2 + $0xc0] sm:$0xff]  ;;  %v1203_v12 = vld [vmem:[#allocation2 + $0xd0] sm:$0xff] }
 0x26b   :  { %2086 = vmatmul.mubr.msk.f32.vlgmr.msra.gmra.mrb[16].mxu0 %vm676_vm2, %v808_v49  ;;  %v819_v48 = vadd.f32 %v805_v35, %v797_v25  ;;  %v798_v46 = vmul.f32 %v783_v11, %v2842_v3  ;;  %v821_v5 = vadd.f32 %v805_v35, %v799_v21  ;;  %v800_v2 = vmul.f32 %v783_v11, %v2854_v27  ;;  %v1178_v3 = vld [vmem:[#allocation2 + $0x8] sm:$0xff]  ;;  %v1180_v27 = vld [vmem:[#allocation2 + $0x18] sm:$0xff]  ;;  %v1195_v21 = vld [vmem:[#allocation2 + $0x90] sm:$0xff] }
 0x26c   :  { %2088 = vmatprep.mubr.msk.f32.mxu0 %vm676_vm2, %v809_v36  ;;  %v2137_v20 = vpack.c.bf16 %v1180_v27, %v1178_v3  ;;  %v2153_v11 = vpack.c.bf16 %v1196_v10, %v1194_v9  ;;  %v2155_v23 = vpack.c.bf16 %v1195_v21, %v1193_v15  ;;  %v2157_v4 = vpack.c.bf16 %v1200_v28, %v1198_v26  ;;  %v1206_v41 = vld [vmem:[#allocation2 + $0xe8] sm:$0xff]  ;;  %v1208_v25 = vld [vmem:[#allocation2 + $0xf8] sm:$0xff] }
 0x26d   :  { %v820_v43 = vadd.f32 %v805_v35, %v798_v46  ;;  %v822_v61 = vadd.f32 %v805_v35, %v800_v2  ;;  %v2159_v35 = vpack.c.bf16 %v1199_v30, %v1197_v29  ;;  %v2161_v22 = vpack.c.bf16 %v1204_v40, %v1202_v37 }
 0x26e   :  { %2169 = vmatprep.subr.bf16.mxu1 %v2137_v20  ;;  %2138 = vmatprep.subr.bf16.mxu0 %v2137_v20  ;;  %v2401_v38 = vmov 0.0   ;;  %v2163_v49 = vpack.c.bf16 %v1203_v12, %v1201_v32  ;;  %v2165_v36 = vpack.c.bf16 %v1208_v25, %v1206_v41 }
 0x26f   :  { %2089 = vmatmul.mubr.msk.f32.gmra.mrb[18].mxu0 %vm676_vm2, %v810_v47  ;;  %2177 = vmatpush1.bf16.msra.mxu1 %v2139_v34  ;;  %v1205_v47 = vld [vmem:[#allocation2 + $0xe0] sm:$0xff] }
 0x270   :  { %2091 = vmatprep.mubr.msk.f32.mxu0 %vm676_vm2, %v811_v33  ;;  %2140 = vmatpush1.bf16.msra.mxu0 %v2139_v34  ;;  %v1207_v33 = vld [vmem:[#allocation2 + $0xf0] sm:$0xff] }
 0x271   :  { %2170 = vmatprep.subr.bf16.mxu1 %v2141_v17  ;;  %2142 = vmatprep.subr.bf16.mxu0 %v2141_v17 }
 0x272   :  { %1309 = vmatprep.mubr.f32.mxu1 %v2401_v38 }
 0x273   :  { %2092 = vmatmul.mubr.msk.f32.gmra.mrb[20].mxu0 %vm676_vm2, %v812_v50  ;;  %2178 = vmatpush1.bf16.msra.mxu1 %v2143_v53  ;;  %v2167_v50 = vpack.c.bf16 %v1207_v33, %v1205_v47 }
 0x274   :  { %2094 = vmatprep.mubr.msk.f32.mxu0 %vm676_vm2, %v813_v45  ;;  %2144 = vmatpush1.bf16.msra.mxu0 %v2143_v53  ;;  %v2911_v45 = vld [vmem:[%s3331_s5 + $0x6] ss:$0 sm:$0xff] }
 0x275   :  { %2171 = vmatprep.subr.bf16.mxu1 %v2145_v54  ;;  %2146 = vmatprep.subr.bf16.mxu0 %v2145_v54 }
 0x277   :  { %2095 = vmatmul.mubr.msk.f32.gmra.mrb[22].mxu0 %vm676_vm2, %v814_v1  ;;  %2179 = vmatpush1.bf16.msra.mxu1 %v2147_v59 }
 0x278   :  { %2097 = vmatprep.mubr.msk.f32.mxu0 %vm676_vm2, %v815_v0  ;;  %2148 = vmatpush1.bf16.msra.mxu0 %v2147_v59 }
 0x279   :  { %2172 = vmatprep.subr.bf16.mxu1 %v2149_v63  ;;  %2150 = vmatprep.subr.bf16.mxu0 %v2149_v63 }
 0x27b   :  { %2098 = vmatmul.mubr.msk.f32.gmra.mrb[24].mxu0 %vm676_vm2, %v816_v39  ;;  %2180 = vmatpush1.bf16.msra.mxu1 %v2151_v8 }
 0x27c   :  { %2100 = vmatprep.mubr.msk.f32.mxu0 %vm676_vm2, %v817_v42  ;;  %2152 = vmatpush1.bf16.msra.mxu0 %v2151_v8 }
 0x27d   :  { %2173 = vmatprep.subr.bf16.mxu1 %v2153_v11  ;;  %2154 = vmatprep.subr.bf16.mxu0 %v2153_v11 }
 0x27f   :  { %2101 = vmatmul.mubr.msk.f32.gmra.mrb[26].mxu0 %vm676_vm2, %v818_v24  ;;  %2181 = vmatpush1.bf16.msra.mxu1 %v2155_v23 }
 0x280   :  { %2103 = vmatprep.mubr.msk.f32.mxu0 %vm676_vm2, %v819_v48  ;;  %2156 = vmatpush1.bf16.msra.mxu0 %v2155_v23 }
 0x281   :  { %2174 = vmatprep.subr.bf16.mxu1 %v2157_v4  ;;  %2158 = vmatprep.subr.bf16.mxu0 %v2157_v4 }
 0x283   :  { %2104 = vmatmul.mubr.msk.f32.gmra.mrb[28].mxu0 %vm676_vm2, %v820_v43  ;;  %2182 = vmatpush1.bf16.msra.mxu1 %v2159_v35 }
 0x284   :  { %2106 = vmatprep.mubr.msk.f32.mxu0 %vm676_vm2, %v821_v5  ;;  %2160 = vmatpush1.bf16.msra.mxu0 %v2159_v35 }
 0x285   :  { %2175 = vmatprep.subr.bf16.mxu1 %v2161_v22  ;;  %2162 = vmatprep.subr.bf16.mxu0 %v2161_v22 }
 0x287   :  { %2107 = vmatmul.mubr.msk.f32.gmra.mrb[30].mxu0 %vm676_vm2, %v822_v61  ;;  %2183 = vmatpush1.bf16.msra.mxu1 %v2163_v49 }
 0x288   :  { %1285 = vmatprep.mubr.f32.mxu0 %v2401_v38  ;;  %2164 = vmatpush1.bf16.msra.mxu0 %v2163_v49 }
 0x289   :  { %2176 = vmatprep.subr.bf16.mxu1 %v2165_v36  ;;  %2166 = vmatprep.subr.bf16.mxu0 %v2165_v36 }
 0x28b   :  { %2184 = vmatpush1.bf16.msra.mxu1 %v2167_v50 }
 0x28c   :  { %2168 = vmatpush1.bf16.msra.mxu0 %v2167_v50 }
 0x33e   :  { %v2087_v1 = vpop.f32.mrb[16].mxu0 }
 0x33f   :  { %v958_v0 = vadd.f32 %v2087_v1, %v2911_v45  ;;  %v952_v39 = vpop.f32.mrb[17].mxu0 }
 0x340   :  { %v953_v42 = vadd.f32 %v2911_v45, %v952_v39 }
 0x341   :  { %v1032_v24 = vmul.f32 0.2, %v958_v0 }
 0x342   :  { %v1031_v48 = vmul.f32 0.2, %v953_v42  ;;  %v2090_v46 = vpop.f32.mrb[18].mxu0 }
 0x343   :  { %v2915_v5 = vmax.f32 %v958_v0, %v1032_v24  ;;  %v968_v2 = vadd.f32 %v2090_v46, %v2911_v45  ;;  %v962_v43 = vpop.f32.mrb[19].mxu0 }
 0x344   :  { %v2918_v61 = vmax.f32 %v953_v42, %v1031_v48  ;;  %v963_v3 = vadd.f32 %v2911_v45, %v962_v43 }
 0x345   :  { %v1034_v27 = vmul.f32 0.2, %v968_v2  ;;  %v1086_v20 = vmul.f32 %v2915_v5, %v2915_v5 }
 0x346   :  { %v1085_v19 = vmul.f32 %v2918_v61, %v2918_v61  ;;  %v1033_v44 = vmul.f32 0.2, %v963_v3  ;;  %v2093_v34 = vpop.f32.mrb[20].mxu0  ;;  %v1063_v51 = vadd.f32 %v2915_v5, %v2918_v61 }
 0x347   :  { %v2925_v58 = vmax.f32 %v968_v2, %v1034_v27  ;;  %v978_v57 = vadd.f32 %v2093_v34, %v2911_v45  ;;  %v972_v17 = vpop.f32.mrb[21].mxu0 }
 0x348   :  { %v2930_v52 = vmax.f32 %v963_v3, %v1033_v44  ;;  %v973_v53 = vadd.f32 %v2911_v45, %v972_v17  ;;  %v1101_v31 = vadd.f32 %v1086_v20, %v1085_v19 }
 0x349   :  { %v1036_v16 = vmul.f32 0.2, %v978_v57  ;;  %v1088_v60 = vmul.f32 %v2925_v58, %v2925_v58 }
 0x34a   :  { %v1064_v54 = vadd.f32 %v1063_v51, %v2930_v52  ;;  %v1087_v55 = vmul.f32 %v2930_v52, %v2930_v52  ;;  %v1035_v56 = vmul.f32 0.2, %v973_v53  ;;  %v2096_v59 = vpop.f32.mrb[22].mxu0 }
 0x34b   :  { %v2938_v62 = vmax.f32 %v978_v57, %v1036_v16  ;;  %v988_v63 = vadd.f32 %v2096_v59, %v2911_v45  ;;  %v982_v6 = vpop.f32.mrb[23].mxu0 }
 0x34c   :  { %v1102_v7 = vadd.f32 %v1101_v31, %v1087_v55  ;;  %v2941_v8 = vmax.f32 %v973_v53, %v1035_v56  ;;  %v1065_v9 = vadd.f32 %v1064_v54, %v2925_v58  ;;  %v983_v10 = vadd.f32 %v2911_v45, %v982_v6 }
 0x34d   :  { %v1038_v11 = vmul.f32 0.2, %v988_v63  ;;  %v1090_v4 = vmul.f32 %v2938_v62, %v2938_v62 }
 0x34e   :  { %v1066_v15 = vadd.f32 %v1065_v9, %v2941_v8  ;;  %v1089_v21 = vmul.f32 %v2941_v8, %v2941_v8  ;;  %v1103_v23 = vadd.f32 %v1102_v7, %v1088_v60  ;;  %v1037_v26 = vmul.f32 0.2, %v983_v10  ;;  %v2099_v28 = vpop.f32.mrb[24].mxu0 }
 0x34f   :  { %v2950_v29 = vmax.f32 %v988_v63, %v1038_v11  ;;  %v998_v30 = vadd.f32 %v2099_v28, %v2911_v45  ;;  %v992_v35 = vpop.f32.mrb[25].mxu0 }
 0x350   :  { %v1104_v37 = vadd.f32 %v1103_v23, %v1089_v21  ;;  %v2953_v40 = vmax.f32 %v983_v10, %v1037_v26  ;;  %v1067_v32 = vadd.f32 %v1066_v15, %v2938_v62  ;;  %v993_v22 = vadd.f32 %v2911_v45, %v992_v35 }
 0x351   :  { %v1040_v12 = vmul.f32 0.2, %v998_v30  ;;  %v1092_v33 = vmul.f32 %v2950_v29, %v2950_v29 }
 0x352   :  { %v1068_v41 = vadd.f32 %v1067_v32, %v2953_v40  ;;  %v1091_v25 = vmul.f32 %v2953_v40, %v2953_v40  ;;  %v1105_v49 = vadd.f32 %v1104_v37, %v1090_v4  ;;  %v1039_v36 = vmul.f32 0.2, %v993_v22  ;;  %v2102_v47 = vpop.f32.mrb[26].mxu0 }
 0x353   :  { %v2962_v50 = vmax.f32 %v998_v30, %v1040_v12  ;;  %v1008_v1 = vadd.f32 %v2102_v47, %v2911_v45  ;;  %v1002_v0 = vpop.f32.mrb[27].mxu0 }
 0x354   :  { %v1106_v39 = vadd.f32 %v1105_v49, %v1091_v25  ;;  %v2965_v42 = vmax.f32 %v993_v22, %v1039_v36  ;;  %v1069_v24 = vadd.f32 %v1068_v41, %v2950_v29  ;;  %v1003_v48 = vadd.f32 %v2911_v45, %v1002_v0 }
 0x355   :  { %v1042_v46 = vmul.f32 0.2, %v1008_v1  ;;  %v1094_v19 = vmul.f32 %v2962_v50, %v2962_v50 }
 0x356   :  { %v1070_v2 = vadd.f32 %v1069_v24, %v2965_v42  ;;  %v1093_v43 = vmul.f32 %v2965_v42, %v2965_v42  ;;  %v1107_v3 = vadd.f32 %v1106_v39, %v1092_v33  ;;  %v1041_v27 = vmul.f32 0.2, %v1003_v48  ;;  %v2105_v20 = vpop.f32.mrb[28].mxu0 }
 0x357   :  { %v2974_v44 = vmax.f32 %v1008_v1, %v1042_v46  ;;  %v1018_v34 = vadd.f32 %v2105_v20, %v2911_v45  ;;  %v1012_v57 = vpop.f32.mrb[29].mxu0 }
 0x358   :  { %v1108_v17 = vadd.f32 %v1107_v3, %v1093_v43  ;;  %v2977_v51 = vmax.f32 %v1003_v48, %v1041_v27  ;;  %v1071_v53 = vadd.f32 %v1070_v2, %v2962_v50  ;;  %v1013_v16 = vadd.f32 %v2911_v45, %v1012_v57 }
 0x359   :  { %v1044_v31 = vmul.f32 0.2, %v1018_v34  ;;  %v1096_v63 = vmul.f32 %v2974_v44, %v2974_v44 }
 0x35a   :  { %v1072_v54 = vadd.f32 %v1071_v53, %v2977_v51  ;;  %v1095_v55 = vmul.f32 %v2977_v51, %v2977_v51  ;;  %v1109_v56 = vadd.f32 %v1108_v17, %v1094_v19  ;;  %v1043_v59 = vmul.f32 0.2, %v1013_v16  ;;  %v2108_v60 = vpop.f32.mrb[30].mxu0 }
 0x35b   :  { %v2986_v6 = vmax.f32 %v1018_v34, %v1044_v31  ;;  %v1028_v7 = vadd.f32 %v2108_v60, %v2911_v45  ;;  %v1022_v9 = vpop.f32.mrb[31].mxu0 }
 0x35c   :  { %v1110_v10 = vadd.f32 %v1109_v56, %v1095_v55  ;;  %v1059_v11 = vmax.f32 %v1013_v16, %v1043_v59  ;;  %v1073_v15 = vadd.f32 %v1072_v54, %v2974_v44  ;;  %v1023_v21 = vadd.f32 %v2911_v45, %v1022_v9  ;;  %v1126_v54 = vld [vmem:[%s3331_s5 + $0x7] sm:$0x1]  ;;  %v1130_v59 = vld [vmem:[%s3331_s5 + $0x8] sm:$0x1] }
 0x35d   :  { %v1046_v23 = vmul.f32 0.2, %v1028_v7  ;;  %v1098_v35 = vmul.f32 %v2986_v6, %v2986_v6 }
 0x35e   :  { %v1074_v26 = vadd.f32 %v1073_v15, %v1059_v11  ;;  %v1097_v28 = vmul.f32 %v1059_v11, %v1059_v11  ;;  %v1111_v4 = vadd.f32 %v1110_v10, %v1096_v63  ;;  %v1045_v30 = vmul.f32 0.2, %v1023_v21 }
 0x35f   :  { %v2993_v32 = vmax.f32 %v1028_v7, %v1046_v23 }
 0x360   :  { %v1112_v37 = vadd.f32 %v1111_v4, %v1097_v28  ;;  %v2995_v22 = vmax.f32 %v1023_v21, %v1045_v30  ;;  %v1075_v12 = vadd.f32 %v1074_v26, %v2986_v6 }
 0x361   :  { %v1100_v49 = vmul.f32 %v2993_v32, %v2993_v32 }
 0x362   :  { %v1076_v41 = vadd.f32 %v1075_v12, %v2995_v22  ;;  %v1099_v45 = vmul.f32 %v2995_v22, %v2995_v22  ;;  %v1113_v25 = vadd.f32 %v1112_v37, %v1098_v35 }
 0x364   :  { %v1077_v36 = vadd.f32 %v1076_v41, %v2993_v32  ;;  %v1114_v47 = vadd.f32 %v1113_v25, %v1099_v45 }
 0x366   :  { %v1078_v33 = vrot.slane %v1077_v36, 4  ;;  %v1115_v1 = vadd.f32 %v1114_v47, %v1100_v49 }
 0x368   :  { %v1079_v0 = vadd.f32 %v1078_v33, %v1077_v36  ;;  %v1116_v39 = vrot.slane %v1115_v1, 4 }
 0x36a   :  { %v1080_v24 = vrot.slane %v1079_v0, 2  ;;  %v1117_v48 = vadd.f32 %v1116_v39, %v1115_v1 }
 0x36c   :  { %v1081_v46 = vadd.f32 %v1080_v24, %v1079_v0  ;;  %v1118_v2 = vrot.slane %v1117_v48, 2 }
 0x36e   :  { %v1082_v43 = vrot.slane %v1081_v46, 1  ;;  %v1119_v3 = vadd.f32 %v1118_v2, %v1117_v48 }
 0x370   :  { %v1083_v27 = vadd.f32 %v1082_v43, %v1081_v46  ;;  %v1120_v20 = vrot.slane %v1119_v3, 1 }
 0x372   :  { %v1084_v19 = vmul.f32 0.0078125, %v1083_v27  ;;  %v1121_v34 = vadd.f32 %v1120_v20, %v1119_v3 }
 0x374   :  { %v1122_v57 = vmul.f32 0.0078125, %v1121_v34  ;;  %v1123_v17 = vmul.f32 %v1084_v19, %v1084_v19 }
 0x376   :  { %v1124_v53 = vsub.f32 %v1122_v57, %v1123_v17 }
 0x378   :  { %v1125_v16 = vmax.f32 %v1124_v53, 0.0 }
 0x37a   :  { %v1127_v31 = vadd.f32 1e-05, %v1125_v16 }
 0x37c   :  { %2196 = vrsqrt.f32 %v1127_v31 }
 0x386   :  { %v2197_v55 = vpop.eup %2196 }
 0x387   :  { %v1129_v56 = vmul.f32 %v2197_v55, %v1126_v54 }
 0x389   :  { %v1131_v60 = vmul.f32 %v1129_v56, %v1084_v19  ;;  %v1137_v63 = vrot.slane %v1129_v56, %v2677_v18 }
 0x38b   :  { %v1132_v7 = vsub.f32 %v1130_v59, %v1131_v60  ;;  %v1139_v9 = vmul.f32 %v1137_v63, %v2918_v61  ;;  %v1143_v10 = vmul.f32 %v1137_v63, %v2941_v8  ;;  %v1140_v15 = vmul.f32 %v1137_v63, %v2915_v5 }
 0x38c   :  { %v1144_v21 = vmul.f32 %v1137_v63, %v2938_v62  ;;  %v1141_v23 = vmul.f32 %v1137_v63, %v2930_v52  ;;  %v1145_v26 = vmul.f32 %v1137_v63, %v2953_v40  ;;  %v1142_v28 = vmul.f32 %v1137_v63, %v2925_v58 }
 0x38d   :  { %v1159_v4 = vrot.slane %v1132_v7, %v2677_v18  ;;  %v1146_v30 = vmul.f32 %v1137_v63, %v2950_v29  ;;  %v1147_v35 = vmul.f32 %v1137_v63, %v2965_v42  ;;  %v1148_v61 = vmul.f32 %v1137_v63, %v2962_v50 }
 0x38e   :  { %v1149_v8 = vmul.f32 %v1137_v63, %v2977_v51  ;;  %v1150_v5 = vmul.f32 %v1137_v63, %v2974_v44  ;;  %v1151_v37 = vmul.f32 %v1137_v63, %v1059_v11  ;;  %v1152_v62 = vmul.f32 %v1137_v63, %v2986_v6 }
 0x38f   :  { %v1161_v52 = vadd.f32 %v1159_v4, %v1139_v9  ;;  %v1165_v12 = vadd.f32 %v1159_v4, %v1143_v10  ;;  %v1162_v40 = vadd.f32 %v1159_v4, %v1140_v15  ;;  %v1166_v41 = vadd.f32 %v1159_v4, %v1144_v21 }
 0x390   :  { %v1163_v58 = vadd.f32 %v1159_v4, %v1141_v23  ;;  %v1167_v45 = vadd.f32 %v1159_v4, %v1145_v26  ;;  %v1164_v25 = vadd.f32 %v1159_v4, %v1142_v28  ;;  %v1168_v49 = vadd.f32 %v1159_v4, %v1146_v30 }
 0x391   :  { %1286 = vmatmul.mubr.f32.vlgmr.msra.gmra.mrb[32].mxu0 %v1161_v52  ;;  %1310 = vmatmul.mubr.f32.vlgmr.msra.gmra.mrb[16].mxu1 %v1165_v12  ;;  %v1169_v29 = vadd.f32 %v1159_v4, %v1147_v35  ;;  %v1170_v42 = vadd.f32 %v1159_v4, %v1148_v61  ;;  %v1171_v50 = vadd.f32 %v1159_v4, %v1149_v8 }
 0x392   :  { %1291 = vmatprep.mubr.f32.mxu0 %v2401_v38  ;;  %1315 = vmatprep.mubr.f32.mxu1 %v2401_v38  ;;  %v1172_v44 = vadd.f32 %v1159_v4, %v1150_v5  ;;  %v1173_v51 = vadd.f32 %v1159_v4, %v1151_v37  ;;  %v1174_v6 = vadd.f32 %v1159_v4, %v1152_v62 }
 0x393   :  { %v1153_v11 = vmul.f32 %v1137_v63, %v2995_v22  ;;  %v1154_v36 = vmul.f32 %v1137_v63, %v2993_v32  ;;  %v1209_v32 = vld [vmem:[%s3331_s5 + $0x9] sm:$0x3]  ;;  %v1217_v22 = vsub.s32 1, %v2671_v14  ;;  %s2403_s5 = smov [#allocation6]  }
 0x394   :  { %v3046_v1 = vrot.slane %v1209_v32, %v2677_v18  ;;  %s1851_s4 = sshll.u32 %s2403_s5, 4  ;;  %s1852_s4 = int_to_ptr.vmem [resolvable:$true] %s1851_s4 }
 0x395   :  { %1292 = vmatmul.mubr.f32.gmra.mrb[34].mxu0 %v1162_v40  ;;  %1316 = vmatmul.mubr.f32.gmra.mrb[18].mxu1 %v1166_v41  ;;  %v1175_v47 = vadd.f32 %v1159_v4, %v1153_v11  ;;  %v1176_v33 = vadd.f32 %v1159_v4, %v1154_v36  ;;  %v3048_v0 = vrot.slane %v1209_v32, %v1217_v22  ;;  %s2348_s21 = scalar_lea.vmem %s1852_s4, 32  ;;  %p2353_p9 = scmp.lt.s32.totalorder %s1852_s4, %s1852_s4 }
 0x396   :  { %1297 = vmatprep.mubr.f32.mxu0 %v2401_v38  ;;  %1321 = vmatprep.mubr.f32.mxu1 %v2401_v38  ;;  %p2349_p8 = scmp.ne.s32.totalorder %s1852_s4, %s2348_s21  ;;  %p2354_p10 = scmp.lt.s32.totalorder %s2348_s21, %s2348_s21 }
 0x398   :  { %p2355_p11 = por %p2354_p10, %p2353_p9 }
 0x399   :  { %1298 = vmatmul.mubr.f32.gmra.mrb[36].mxu0 %v1163_v58  ;;  %1322 = vmatmul.mubr.f32.gmra.mrb[20].mxu1 %v1167_v45 }
 0x39a   :  { %1303 = vmatprep.mubr.f32.mxu0 %v2401_v38  ;;  %1327 = vmatprep.mubr.f32.mxu1 %v2401_v38  ;;  %p2356_p12 = pnand %p2355_p11, %p2349_p8 }
 0x39d   :  { %1304 = vmatmul.mubr.f32.gmra.mrb[38].mxu0 %v1164_v25  ;;  %1328 = vmatmul.mubr.f32.gmra.mrb[22].mxu1 %v1168_v49 }
 0x39e   :  { %1333 = vmatprep.mubr.f32.mxu1 %v2401_v38 }
 0x3a1   :  { %1334 = vmatmul.mubr.f32.gmra.mrb[24].mxu1 %v1169_v29 }
 0x3a2   :  { %1339 = vmatprep.mubr.f32.mxu1 %v2401_v38 }
 0x3a5   :  { %1340 = vmatmul.mubr.f32.gmra.mrb[26].mxu1 %v1170_v42 }
 0x3a6   :  { %1345 = vmatprep.mubr.f32.mxu1 %v2401_v38 }
 0x3a9   :  { %1346 = vmatmul.mubr.f32.gmra.mrb[28].mxu1 %v1171_v50 }
 0x3aa   :  { %1351 = vmatprep.mubr.f32.mxu1 %v2401_v38 }
 0x3ad   :  { %1352 = vmatmul.mubr.f32.gmra.mrb[30].mxu1 %v1172_v44 }
 0x3ae   :  { %1357 = vmatprep.mubr.f32.mxu1 %v2401_v38 }
 0x3b1   :  { %1358 = vmatmul.mubr.f32.gmra.mrb[32].mxu1 %v1173_v51 }
 0x3b2   :  { %1363 = vmatprep.mubr.f32.mxu1 %v2401_v38 }
 0x3b5   :  { %1364 = vmatmul.mubr.f32.gmra.mrb[34].mxu1 %v1174_v6 }
 0x3b6   :  { %1369 = vmatprep.mubr.f32.mxu1 %v2401_v38 }
 0x3b9   :  { %1370 = vmatmul.mubr.f32.gmra.mrb[36].mxu1 %v1175_v47 }
 0x3ba   :  { %1375 = vmatprep.mubr.f32.mxu1 %v2401_v38 }
 0x3bd   :  { %1376 = vmatmul.mubr.f32.gmra.mrb[38].mxu1 %v1176_v33 }
 0x464   :  { %v1287_v39 = vpop.f32.mrb[32].mxu0  ;;  %v1311_v24 = vpop.f32.mrb[16].mxu1 }
 0x465   :  { %v1288_v48 = vadd.f32 %v1287_v39, %v3046_v1  ;;  %v3052_v46 = vadd.f32 %v1311_v24, %v3046_v1  ;;  %v1289_v2 = vpop.f32.mrb[33].mxu0  ;;  %v1313_v43 = vpop.f32.mrb[17].mxu1 }
 0x466   :  { %v1290_v3 = vadd.f32 %v1289_v2, %v3048_v0  ;;  %v3056_v27 = vadd.f32 %v1313_v43, %v3048_v0 }
 0x467   :  { %v1449_v20 = vmul.f32 0.5, %v1288_v48  ;;  %v1457_v18 = vmul.f32 0.5, %v3052_v46 }
 0x468   :  { %v1450_v19 = vmul.f32 0.5, %v1290_v3  ;;  %v1458_v34 = vmul.f32 0.5, %v3056_v27  ;;  %v1293_v57 = vpop.f32.mrb[34].mxu0  ;;  %v1317_v17 = vpop.f32.mrb[18].mxu1 }
 0x469   :  { %2198 = vtanh.f32 %v1449_v20  ;;  %v1294_v53 = vadd.f32 %v1293_v57, %v3046_v1  ;;  %v3062_v16 = vadd.f32 %v1317_v17, %v3046_v1  ;;  %v1295_v31 = vpop.f32.mrb[35].mxu0  ;;  %v1319_v54 = vpop.f32.mrb[19].mxu1 }
 0x46a   :  { %2200 = vtanh.f32 %v1457_v18  ;;  %v1296_v55 = vadd.f32 %v1295_v31, %v3048_v0  ;;  %v3066_v56 = vadd.f32 %v1319_v54, %v3048_v0 }
 0x46b   :  { %2202 = vtanh.f32 %v1450_v19  ;;  %v1382_v59 = vadd.f32 %v1294_v53, %v1288_v48  ;;  %v1451_v60 = vmul.f32 0.5, %v1294_v53  ;;  %v1459_v63 = vmul.f32 0.5, %v3062_v16 }
 0x46c   :  { %2204 = vtanh.f32 %v1458_v34  ;;  %v1403_v7 = vadd.f32 %v1296_v55, %v1290_v3  ;;  %v1452_v9 = vmul.f32 0.5, %v1296_v55  ;;  %v1460_v10 = vmul.f32 0.5, %v3066_v56  ;;  %v1299_v15 = vpop.f32.mrb[36].mxu0  ;;  %v1323_v21 = vpop.f32.mrb[20].mxu1 }
 0x46d   :  { %2206 = vtanh.f32 %v1451_v60  ;;  %v1300_v23 = vadd.f32 %v1299_v15, %v3046_v1  ;;  %v1324_v26 = vadd.f32 %v1323_v21, %v3046_v1  ;;  %v1301_v28 = vpop.f32.mrb[37].mxu0  ;;  %v1325_v4 = vpop.f32.mrb[21].mxu1 }
 0x46e   :  { %2208 = vtanh.f32 %v1459_v63  ;;  %v1302_v30 = vadd.f32 %v1301_v28, %v3048_v0  ;;  %v3074_v35 = vadd.f32 %v1325_v4, %v3048_v0 }
 0x46f   :  { %2210 = vtanh.f32 %v1452_v9  ;;  %v1383_v61 = vadd.f32 %v1382_v59, %v1300_v23  ;;  %v1453_v8 = vmul.f32 0.5, %v1300_v23  ;;  %v1461_v5 = vmul.f32 0.5, %v1324_v26 }
 0x470   :  { %2212 = vtanh.f32 %v1460_v10  ;;  %v1404_v37 = vadd.f32 %v1403_v7, %v1302_v30  ;;  %v1454_v62 = vmul.f32 0.5, %v1302_v30  ;;  %v1462_v52 = vmul.f32 0.5, %v3074_v35  ;;  %v1305_v12 = vpop.f32.mrb[38].mxu0  ;;  %v1329_v40 = vpop.f32.mrb[22].mxu1 }
 0x471   :  { %2214 = vtanh.f32 %v1453_v8  ;;  %v1306_v41 = vadd.f32 %v1305_v12, %v3046_v1  ;;  %v3079_v58 = vadd.f32 %v1329_v40, %v3046_v1  ;;  %v1307_v45 = vpop.f32.mrb[39].mxu0  ;;  %v1331_v25 = vpop.f32.mrb[23].mxu1 }
 0x472   :  { %2216 = vtanh.f32 %v1461_v5  ;;  %v1308_v49 = vadd.f32 %v1307_v45, %v3048_v0  ;;  %v3083_v29 = vadd.f32 %v1331_v25, %v3048_v0 }
 0x473   :  { %v2199_v42 = vpop.eup %2198  ;;  %2218 = vtanh.f32 %v1454_v62  ;;  %v1384_v50 = vadd.f32 %v1383_v61, %v1306_v41  ;;  %v1455_v44 = vmul.f32 0.5, %v1306_v41  ;;  %v1463_v51 = vmul.f32 0.5, %v3079_v58 }
 0x474   :  { %v2201_v6 = vpop.eup %2200  ;;  %v1513_v11 = vmul.f32 0.5, %v2199_v42  ;;  %2220 = vtanh.f32 %v1462_v52  ;;  %v1405_v36 = vadd.f32 %v1404_v37, %v1308_v49  ;;  %v1456_v47 = vmul.f32 0.5, %v1308_v49  ;;  %v3086_v33 = vpop.f32.mrb[24].mxu1 }
 0x475   :  { %v2203_v32 = vpop.eup %2202  ;;  %v1521_v22 = vmul.f32 0.5, %v2201_v6  ;;  %v1385_v39 = vadd.f32 %v1384_v50, %v3052_v46  ;;  %2222 = vtanh.f32 %v1455_v44  ;;  %v3090_v24 = vmul.f32 0.5, %v3083_v29  ;;  %v3092_v48 = vpop.f32.mrb[25].mxu1 }
 0x476   :  { %v2205_v2 = vpop.eup %2204  ;;  %v1545_v43 = vadd.f32 0.5, %v1513_v11  ;;  %v1514_v3 = vmul.f32 0.5, %v2203_v32  ;;  %2224 = vtanh.f32 %v1463_v51  ;;  %v1406_v20 = vadd.f32 %v1405_v36, %v3056_v27 }
 0x477   :  { %v2207_v18 = vpop.eup %2206  ;;  %v1553_v19 = vadd.f32 0.5, %v1521_v22  ;;  %v1522_v34 = vmul.f32 0.5, %v2205_v2  ;;  %v1386_v57 = vadd.f32 %v1385_v39, %v3062_v16  ;;  %2226 = vtanh.f32 %v1456_v47 }
 0x478   :  { %v2209_v17 = vpop.eup %2208  ;;  %v1577_v46 = vmul.f32 1.442695, %v1545_v43  ;;  %v1546_v53 = vadd.f32 0.5, %v1514_v3  ;;  %v1515_v31 = vmul.f32 0.5, %v2207_v18  ;;  %v1407_v54 = vadd.f32 %v1406_v20, %v3066_v56  ;;  %v3097_v55 = vpop.f32.mrb[26].mxu1 }
 0x479   :  { %v2211_v59 = vpop.eup %2210  ;;  %v1593_v60 = vmul.f32 1.442695, %v1553_v19  ;;  %v1554_v63 = vadd.f32 0.5, %v1522_v34  ;;  %v1523_v7 = vmul.f32 0.5, %v2209_v17  ;;  %v1387_v9 = vadd.f32 %v1386_v57, %v1324_v26  ;;  %v3099_v27 = vpop.f32.mrb[27].mxu1 }
 0x47a   :  { %v2213_v10 = vpop.eup %2212  ;;  %2228 = vpow2.f32 %v1577_v46  ;;  %v1579_v15 = vmul.f32 1.442695, %v1546_v53  ;;  %v1547_v16 = vadd.f32 0.5, %v1515_v31  ;;  %v1516_v21 = vmul.f32 0.5, %v2211_v59 }
 0x47b   :  { %v2215_v23 = vpop.eup %2214  ;;  %2230 = vpow2.f32 %v1593_v60  ;;  %v1595_v28 = vmul.f32 1.442695, %v1554_v63  ;;  %v1555_v4 = vadd.f32 0.5, %v1523_v7  ;;  %v1524_v30 = vmul.f32 0.5, %v2213_v10 }
 0x47c   :  { %v2217_v56 = vpop.eup %2216  ;;  %2232 = vpow2.f32 %v1579_v15  ;;  %v1581_v61 = vmul.f32 1.442695, %v1547_v16  ;;  %v1548_v8 = vadd.f32 0.5, %v1516_v21  ;;  %v1517_v5 = vmul.f32 0.5, %v2215_v23  ;;  %v3101_v37 = vpop.f32.mrb[28].mxu1 }
 0x47d   :  { %v2219_v26 = vpop.eup %2218  ;;  %2234 = vpow2.f32 %v1595_v28  ;;  %v1597_v62 = vmul.f32 1.442695, %v1555_v4  ;;  %v1556_v52 = vadd.f32 0.5, %v1524_v30  ;;  %v1525_v12 = vmul.f32 0.5, %v2217_v56  ;;  %v1349_v40 = vpop.f32.mrb[29].mxu1 }
 0x47e   :  { %v2221_v41 = vpop.eup %2220  ;;  %2236 = vpow2.f32 %v1581_v61  ;;  %v1583_v45 = vmul.f32 1.442695, %v1548_v8  ;;  %v1549_v25 = vadd.f32 0.5, %v1517_v5  ;;  %v1518_v49 = vmul.f32 0.5, %v2219_v26 }
 0x47f   :  { %v2223_v42 = vpop.eup %2222  ;;  %2238 = vpow2.f32 %v1597_v62  ;;  %v1599_v50 = vmul.f32 1.442695, %v1556_v52  ;;  %v1557_v44 = vadd.f32 0.5, %v1525_v12  ;;  %v1526_v51 = vmul.f32 0.5, %v2221_v41 }
 0x480   :  { %v2225_v6 = vpop.eup %2224  ;;  %2240 = vpow2.f32 %v1583_v45  ;;  %v1585_v11 = vmul.f32 1.442695, %v1549_v25  ;;  %v1550_v36 = vadd.f32 0.5, %v1518_v49  ;;  %v1519_v47 = vmul.f32 0.5, %v2223_v42  ;;  %v1353_v32 = vpop.f32.mrb[30].mxu1 }
 0x481   :  { %v2227_v22 = vpop.eup %2226  ;;  %2242 = vpow2.f32 %v1599_v50  ;;  %v1601_v39 = vmul.f32 1.442695, %v1557_v44  ;;  %v1558_v2 = vadd.f32 0.5, %v1526_v51  ;;  %v1388_v43 = vadd.f32 %v1387_v9, %v3079_v58  ;;  %v1355_v3 = vpop.f32.mrb[31].mxu1 }
 0x482   :  { %2244 = vpow2.f32 %v1585_v11  ;;  %v1587_v20 = vmul.f32 1.442695, %v1550_v36  ;;  %v1551_v18 = vadd.f32 0.5, %v1519_v47  ;;  %v1527_v19 = vmul.f32 0.5, %v2225_v6 }
 0x483   :  { %2246 = vpow2.f32 %v1601_v39  ;;  %v1603_v34 = vmul.f32 1.442695, %v1558_v2  ;;  %v1520_v57 = vmul.f32 0.5, %v2227_v22  ;;  %v1408_v17 = vadd.f32 %v1407_v54, %v3074_v35 }
 0x484   :  { %v3105_v46 = vpop.eup %2228  ;;  %2248 = vpow2.f32 %v1587_v20  ;;  %v1589_v53 = vmul.f32 1.442695, %v1551_v18  ;;  %v1559_v31 = vadd.f32 0.5, %v1527_v19  ;;  %v1336_v59 = vadd.f32 %v3086_v33, %v3046_v1  ;;  %v1359_v60 = vpop.f32.mrb[32].mxu1 }
 0x485   :  { %v3109_v58 = vpop.eup %2230  ;;  %2250 = vpow2.f32 %v1603_v34  ;;  %v1552_v63 = vadd.f32 0.5, %v1520_v57  ;;  %v1409_v7 = vadd.f32 %v1408_v17, %v3083_v29  ;;  %v1338_v9 = vadd.f32 %v3092_v48, %v3048_v0  ;;  %v1361_v10 = vpop.f32.mrb[33].mxu1 }
 0x486   :  { %v3114_v35 = vpop.eup %2232  ;;  %2252 = vpow2.f32 %v1589_v53  ;;  %v1605_v54 = vmul.f32 1.442695, %v1559_v31  ;;  %v1389_v15 = vadd.f32 %v1388_v43, %v1336_v59  ;;  %v1465_v16 = vmul.f32 0.5, %v1336_v59 }
 0x487   :  { %v3116_v21 = vpop.eup %2234  ;;  %v1591_v33 = vmul.f32 1.442695, %v1552_v63  ;;  %2254 = vtanh.f32 %v3090_v24  ;;  %v1410_v23 = vadd.f32 %v1409_v7, %v1338_v9  ;;  %v1466_v28 = vmul.f32 0.5, %v1338_v9 }
 0x488   :  { %v3119_v4 = vpop.eup %2236  ;;  %2256 = vpow2.f32 %v1605_v54  ;;  %v1342_v29 = vadd.f32 %v3097_v55, %v3046_v1  ;;  %v1344_v48 = vadd.f32 %v3099_v27, %v3048_v0  ;;  %v1348_v30 = vadd.f32 %v3101_v37, %v3046_v1  ;;  %v1365_v56 = vpop.f32.mrb[34].mxu1 }
 0x489   :  { %v3127_v61 = vpop.eup %2238  ;;  %2258 = vpow2.f32 %v1591_v33  ;;  %v1350_v24 = vadd.f32 %v1349_v40, %v3048_v0  ;;  %v1354_v8 = vadd.f32 %v1353_v32, %v3046_v1  ;;  %v1356_v5 = vadd.f32 %v1355_v3, %v3048_v0  ;;  %v1367_v26 = vpop.f32.mrb[35].mxu1 }
 0x48a   :  { %v3132_v62 = vpop.eup %2240  ;;  %2260 = vtanh.f32 %v1465_v16  ;;  %v1390_v55 = vadd.f32 %v1389_v15, %v1342_v29  ;;  %v1467_v52 = vmul.f32 0.5, %v1342_v29  ;;  %v1411_v27 = vadd.f32 %v1410_v23, %v1344_v48 }
 0x48b   :  { %v3134_v12 = vpop.eup %2242  ;;  %2262 = vtanh.f32 %v1466_v28  ;;  %v1468_v37 = vmul.f32 0.5, %v1344_v48  ;;  %v1469_v41 = vmul.f32 0.5, %v1348_v30  ;;  %v1470_v45 = vmul.f32 0.5, %v1350_v24 }
 0x48c   :  { %v3136_v25 = vpop.eup %2244  ;;  %2264 = vtanh.f32 %v1467_v52  ;;  %v1391_v40 = vadd.f32 %v1390_v55, %v1348_v30  ;;  %v1412_v49 = vadd.f32 %v1411_v27, %v1350_v24  ;;  %v1471_v42 = vmul.f32 0.5, %v1354_v8  ;;  %v1371_v50 = vpop.f32.mrb[36].mxu1 }
 0x48d   :  { %v3138_v44 = vpop.eup %2246  ;;  %2266 = vtanh.f32 %v1468_v37  ;;  %v1472_v51 = vmul.f32 0.5, %v1356_v5  ;;  %v1360_v6 = vadd.f32 %v1359_v60, %v3046_v1  ;;  %v1362_v11 = vadd.f32 %v1361_v10, %v3048_v0  ;;  %v1373_v36 = vpop.f32.mrb[37].mxu1 }
 0x48e   :  { %v3142_v47 = vpop.eup %2248  ;;  %2268 = vtanh.f32 %v1469_v41  ;;  %v1392_v32 = vadd.f32 %v1391_v40, %v1354_v8  ;;  %v1413_v22 = vadd.f32 %v1412_v49, %v1356_v5  ;;  %v1366_v39 = vadd.f32 %v1365_v56, %v3046_v1 }
 0x48f   :  { %v3145_v2 = vpop.eup %2250  ;;  %2270 = vtanh.f32 %v1470_v45  ;;  %v1473_v43 = vmul.f32 0.5, %v1360_v6  ;;  %v1474_v3 = vmul.f32 0.5, %v1362_v11  ;;  %v1641_v20 = vadd.f32 %v3114_v35, %v3105_v46 }
 0x490   :  { %v3149_v18 = vpop.eup %2252  ;;  %2272 = vtanh.f32 %v1471_v42  ;;  %v1393_v19 = vadd.f32 %v1392_v32, %v1360_v6  ;;  %v1414_v34 = vadd.f32 %v1413_v22, %v1362_v11  ;;  %v1475_v57 = vmul.f32 0.5, %v1366_v39  ;;  %v1377_v17 = vpop.f32.mrb[38].mxu1 }
 0x491   :  { %v2255_v53 = vpop.eup %2254  ;;  %2274 = vtanh.f32 %v1472_v51  ;;  %1642 = vadd.xlane.f32.xlu0 %v1641_v20  ;;  %v1368_v31 = vadd.f32 %v1367_v26, %v3048_v0  ;;  %v1372_v59 = vadd.f32 %v1371_v50, %v3046_v1  ;;  %v1656_v60 = vadd.f32 %v3134_v12, %v3127_v61  ;;  %v3155_v63 = vpop.f32.mrb[39].mxu1 }
 0x492   :  { %v3157_v7 = vpop.eup %2256  ;;  %v1528_v9 = vmul.f32 0.5, %v2255_v53  ;;  %2276 = vtanh.f32 %v1473_v43  ;;  %v1394_v10 = vadd.f32 %v1393_v19, %v1366_v39  ;;  %v1653_v54 = vadd.f32 %v3116_v21, %v3109_v58 }
 0x493   :  { %v3161_v15 = vpop.eup %2258  ;;  %2278 = vtanh.f32 %v1474_v3  ;;  %v1415_v16 = vadd.f32 %v1414_v34, %v1368_v31  ;;  %v1476_v33 = vmul.f32 0.5, %v1368_v31  ;;  %v1477_v23 = vmul.f32 0.5, %v1372_v59  ;;  %1657 = vadd.xlane.f32.xlu1 %v1656_v60 }
 0x494   :  { %v2261_v28 = vpop.eup %2260  ;;  %v1560_v29 = vadd.f32 0.5, %v1528_v9  ;;  %2280 = vtanh.f32 %v1475_v57  ;;  %v1395_v48 = vadd.f32 %v1394_v10, %v1372_v59  ;;  %v1374_v30 = vadd.f32 %v1373_v36, %v3048_v0 }
 0x495   :  { %v2263_v56 = vpop.eup %2262  ;;  %v1529_v24 = vmul.f32 0.5, %v2261_v28  ;;  %2282 = vtanh.f32 %v1476_v33  ;;  %1654 = vadd.xlane.f32.xlu0 %v1653_v54  ;;  %v1378_v8 = vadd.f32 %v1377_v17, %v3046_v1  ;;  %v1647_v5 = vadd.f32 %v3142_v47, %v3136_v25 }
 0x496   :  { %v2265_v26 = vpop.eup %2264  ;;  %v1607_v55 = vmul.f32 1.442695, %v1560_v29  ;;  %v1530_v52 = vmul.f32 0.5, %v2263_v56  ;;  %2284 = vtanh.f32 %v1477_v23  ;;  %v3167_v27 = vadd.f32 %v1415_v16, %v1374_v30 }
 0x497   :  { %v2267_v37 = vpop.eup %2266  ;;  %v1561_v41 = vadd.f32 0.5, %v1529_v24  ;;  %v1531_v45 = vmul.f32 0.5, %v2265_v26  ;;  %v1478_v40 = vmul.f32 0.5, %v1374_v30  ;;  %v1396_v49 = vadd.f32 %v1395_v48, %v1378_v8  ;;  %1648 = vadd.xlane.f32.xlu1 %v1647_v5 }
 0x498   :  { %v2269_v42 = vpop.eup %2268  ;;  %2286 = vpow2.f32 %v1607_v55  ;;  %v1562_v50 = vadd.f32 0.5, %v1530_v52  ;;  %v1532_v51 = vmul.f32 0.5, %v2267_v37  ;;  %v3169_v1 = vmul.f32 0.5, %v1378_v8 }
 0x499   :  { %v2271_v6 = vpop.eup %2270  ;;  %v1609_v11 = vmul.f32 1.442695, %v1561_v41  ;;  %v1563_v36 = vadd.f32 0.5, %v1531_v45  ;;  %v1533_v32 = vmul.f32 0.5, %v2269_v42  ;;  %2288 = vtanh.f32 %v1478_v40 }
 0x49a   :  { %v2273_v22 = vpop.eup %2272  ;;  %v1611_v39 = vmul.f32 1.442695, %v1562_v50  ;;  %v1564_v43 = vadd.f32 0.5, %v1532_v51  ;;  %v1534_v3 = vmul.f32 0.5, %v2271_v6  ;;  %v1397_v20 = vrot.slane %v1396_v49, 4 }
 0x49b   :  { %v2275_v19 = vpop.eup %2274  ;;  %2290 = vpow2.f32 %v1609_v11  ;;  %v1613_v34 = vmul.f32 1.442695, %v1563_v36  ;;  %v1565_v57 = vadd.f32 0.5, %v1533_v32  ;;  %v1535_v17 = vmul.f32 0.5, %v2273_v22 }
 0x49c   :  { %v2277_v53 = vpop.eup %2276  ;;  %2292 = vpow2.f32 %v1611_v39  ;;  %v1615_v31 = vmul.f32 1.442695, %v1564_v43  ;;  %v1566_v59 = vadd.f32 0.5, %v1534_v3  ;;  %v1536_v60 = vmul.f32 0.5, %v2275_v19 }
 0x49d   :  { %v2279_v9 = vpop.eup %2278  ;;  %2294 = vpow2.f32 %v1613_v34  ;;  %v1617_v10 = vmul.f32 1.442695, %v1565_v57  ;;  %v1567_v54 = vadd.f32 0.5, %v1535_v17  ;;  %v1537_v16 = vmul.f32 0.5, %v2277_v53 }
 0x49e   :  { %v2281_v33 = vpop.eup %2280  ;;  %2296 = vpow2.f32 %v1615_v31  ;;  %v1619_v23 = vmul.f32 1.442695, %v1566_v59  ;;  %v1568_v28 = vadd.f32 0.5, %v1536_v60  ;;  %v1538_v29 = vmul.f32 0.5, %v2279_v9 }
 0x49f   :  { %v2283_v48 = vpop.eup %2282  ;;  %2298 = vpow2.f32 %v1617_v10  ;;  %v1621_v30 = vmul.f32 1.442695, %v1567_v54  ;;  %v1569_v56 = vadd.f32 0.5, %v1537_v16  ;;  %v1539_v24 = vmul.f32 0.5, %v2281_v33 }
 0x4a0   :  { %v2285_v8 = vpop.eup %2284  ;;  %2300 = vpow2.f32 %v1619_v23  ;;  %v1623_v5 = vmul.f32 1.442695, %v1568_v28  ;;  %v1570_v26 = vadd.f32 0.5, %v1538_v29  ;;  %v1540_v55 = vmul.f32 0.5, %v2283_v48 }
 0x4a1   :  { %2302 = vpow2.f32 %v1621_v30  ;;  %v1625_v52 = vmul.f32 1.442695, %v1569_v56  ;;  %v1571_v37 = vadd.f32 0.5, %v1539_v24  ;;  %v1541_v41 = vmul.f32 0.5, %v2285_v8 }
 0x4a2   :  { %v3171_v45 = vpop.eup %2286  ;;  %2304 = vpow2.f32 %v1623_v5  ;;  %v1627_v40 = vmul.f32 1.442695, %v1570_v26  ;;  %v1572_v42 = vadd.f32 0.5, %v1540_v55  ;;  %v1398_v50 = vadd.f32 %v1397_v20, %v1396_v49 }
 0x4a3   :  { %v2289_v51 = vpop.eup %2288  ;;  %2306 = vpow2.f32 %v1625_v52  ;;  %v1629_v6 = vmul.f32 1.442695, %v1571_v37  ;;  %v1573_v11 = vadd.f32 0.5, %v1541_v41  ;;  %v1644_v36 = vadd.f32 %v3132_v62, %v3119_v4 }
 0x4a4   :  { %2308 = vpow2.f32 %v1627_v40  ;;  %v1631_v32 = vmul.f32 1.442695, %v1572_v42  ;;  %v1542_v22 = vmul.f32 0.5, %v2289_v51  ;;  %v1399_v39 = vrot.slane %v1398_v50, 2 }
 0x4a5   :  { %v3175_v43 = vpop.eup %2290  ;;  %2310 = vpow2.f32 %v1629_v6  ;;  %v1633_v3 = vmul.f32 1.442695, %v1573_v11  ;;  %1645 = vadd.xlane.f32.xlu0 %v1644_v36  ;;  %v1380_v19 = vadd.f32 %v3155_v63, %v3048_v0  ;;  %v1650_v49 = vadd.f32 %v3161_v15, %v3149_v18 }
 0x4a6   :  { %v3181_v20 = vpop.eup %2292  ;;  %2312 = vpow2.f32 %v1631_v32  ;;  %v1574_v34 = vadd.f32 0.5, %v1542_v22  ;;  %v1400_v57 = vadd.f32 %v1399_v39, %v1398_v50  ;;  %v1659_v59 = vadd.f32 %v3145_v2, %v3138_v44 }
 0x4a7   :  { %v3183_v17 = vpop.eup %2294  ;;  %2314 = vpow2.f32 %v1633_v3  ;;  %v1417_v53 = vadd.f32 %v3167_v27, %v1380_v19  ;;  %v1480_v31 = vmul.f32 0.5, %v1380_v19  ;;  %1651 = vadd.xlane.f32.xlu1 %v1650_v49  ;;  %v1662_v10 = vadd.f32 %v3171_v45, %v3157_v7 }
 0x4a8   :  { %v3188_v60 = vpop.eup %2296  ;;  %v1635_v0 = vmul.f32 1.442695, %v1574_v34  ;;  %2316 = vtanh.f32 %v3169_v1  ;;  %v1665_v27 = vadd.f32 %v3181_v20, %v3175_v43  ;;  %v1401_v33 = vrot.slane %v1400_v57, 1 }
 0x4a9   :  { %v3191_v63 = vpop.eup %2298  ;;  %v1418_v9 = vrot.slane %v1417_v53, 4  ;;  %2318 = vtanh.f32 %v1480_v31  ;;  %1660 = vadd.xlane.f32.xlu0 %v1659_v59  ;;  %v1668_v1 = vadd.f32 %v3188_v60, %v3183_v17  ;;  %v2402_v56 = vmov 1966171168  }
 0x4aa   :  { %v3197_v54 = vpop.eup %2300  ;;  %2320 = vpow2.f32 %v1635_v0  ;;  %v1430_v24 = vunpack.c.l.s4 %v2402_v56  ;;  %v1402_v26 = vadd.f32 %v1401_v33, %v1400_v57 }
 0x4ab   :  { %v3199_v16 = vpop.eup %2302  ;;  %v1419_v23 = vadd.f32 %v1418_v9, %v1417_v53  ;;  %1663 = vadd.xlane.f32.xlu1 %v1662_v10  ;;  %v1671_v30 = vadd.f32 %v3197_v54, %v3191_v63 }
 0x4ac   :  { %v3203_v28 = vpop.eup %2304  ;;  %v1431_v50 = vunpack.c.0.s8 %v1430_v24  ;;  %v1424_v11 = vmul.f32 0.0078125, %v1402_v26 }
 0x4ad   :  { %v3205_v29 = vpop.eup %2306  ;;  %v1420_v48 = vrot.slane %v1419_v23, 2  ;;  %1666 = vadd.xlane.f32.xlu0 %v1665_v27  ;;  %v1674_v52 = vadd.f32 %v3203_v28, %v3199_v16 }
 0x4ae   :  { %v3209_v8 = vpop.eup %2308  ;;  %v1434_v57 = vsub.s32 %v1431_v50, %v2671_v14 }
 0x4af   :  { %v3211_v5 = vpop.eup %2310  ;;  %v1421_v55 = vadd.f32 %v1420_v48, %v1419_v23  ;;  %1669 = vadd.xlane.f32.xlu1 %v1668_v1  ;;  %v1677_v42 = vadd.f32 %v3209_v8, %v3205_v29 }
 0x4b0   :  { %v3215_v37 = vpop.eup %2312 }
 0x4b1   :  { %v3217_v41 = vpop.eup %2314  ;;  %v1422_v40 = vrot.slane %v1421_v55, 1  ;;  %1672 = vadd.xlane.f32.xlu0 %v1671_v30  ;;  %v1680_v22 = vadd.f32 %v3215_v37, %v3211_v5 }
 0x4b2   :  { %v2317_v51 = vpop.eup %2316 }
 0x4b3   :  { %v2319_v6 = vpop.eup %2318  ;;  %v1543_v36 = vmul.f32 0.5, %v2317_v51  ;;  %v1423_v32 = vadd.f32 %v1422_v40, %v1421_v55  ;;  %1675 = vadd.xlane.f32.xlu1 %v1674_v52 }
 0x4b4   :  { %v3223_v39 = vpop.eup %2320  ;;  %v1544_v3 = vmul.f32 0.5, %v2319_v6 }
 0x4b5   :  { %v1575_v19 = vadd.f32 0.5, %v1543_v36  ;;  %v1425_v49 = vmul.f32 0.0078125, %v1423_v32  ;;  %1678 = vadd.xlane.f32.xlu0 %v1677_v42  ;;  %v1683_v34 = vadd.f32 %v3223_v39, %v3217_v41 }
 0x4b6   :  { %v1576_v53 = vadd.f32 0.5, %v1544_v3 }
 0x4b7   :  { %v1637_v31 = vmul.f32 1.442695, %v1575_v19  ;;  %1681 = vadd.xlane.f32.xlu1 %v1680_v22  ;;  %v1428_v59 = vcombine.low %v1424_v11, %v1425_v49 }
 0x4b8   :  { %v1639_v0 = vmul.f32 1.442695, %v1576_v53 }
 0x4b9   :  { %2322 = vpow2.f32 %v1637_v31  ;;  %1684 = vadd.xlane.f32.xlu0 %v1683_v34  ;;  %v1435_v9 = vrot.slane %v1428_v59, %v1434_v57 }
 0x4ba   :  { %2324 = vpow2.f32 %v1639_v0 }
 0x4bb   :  { %v1442_v10 = vrot.slane %v1435_v9, %v1434_v57 }
 0x4bd   :  { %1448 = vst.msk [vmem:[#allocation6] sm:$0x3] %vm1446_vm3, %v1442_v10 }
 0x4c3   :  { %v3229_v27 = vpop.eup %2322 }
 0x4c4   :  { %v3231_v33 = vpop.eup %2324 }
 0x4c5   :  { %v1686_v14 = vadd.f32 %v3231_v33, %v3229_v27 }
 0x4c7   :  { %1687 = vadd.xlane.f32.xlu1 %v1686_v14 }
 0x4c8   :  { %2359 = shalt.err (!%p2356_p12)
}
 0x4c9   :  { %s2360_s1 = scalar_lea.hbm %s3333_s7, 32 }
 0x4ca   :  { %p2361_p13 = scmp.ne.s32.totalorder %s3333_s7, %s2360_s1  ;;  %p2364_p0 = scmp.lt.u32.totalorder %s2360_s1, %s3333_s7 }
 0x4cc   :  { %p2366_p1 = pnand %p2364_p0, %p2361_p13 }
 0x4ce   :  { %2369 = shalt.err (!%p2366_p1)
}
 0x4cf   :  { %1854 = dma.vmem_to_hbm [thread:$0]  %s1852_s4, 32, %s3333_s7, [#allocation7]  }
 0x4d0   :  { %s2404_s7 = smov [#allocation5]  }
 0x4d1   :  { %s1838_s30 = sshll.u32 %s2404_s7, 4  ;;  %s1839_s30 = int_to_ptr.vmem [resolvable:$true] %s1838_s30 }
 0x4d2   :  { %s2370_s8 = scalar_lea.vmem %s1839_s30, 4096  ;;  %p2375_p3 = scmp.lt.s32.totalorder %s1839_s30, %s1839_s30 }
 0x4d3   :  { %p2371_p2 = scmp.ne.s32.totalorder %s1839_s30, %s2370_s8  ;;  %p2376_p4 = scmp.lt.s32.totalorder %s2370_s8, %s2370_s8 }
 0x4d5   :  { %p2377_p5 = por %p2376_p4, %p2375_p3 }
 0x4d7   :  { %p2378_p6 = pnand %p2377_p5, %p2371_p2 }
 0x51e   :  { %v1643_v13 = vpop.xlane.xlu0 %1642 }
 0x51f   :  { %v1689_v23 = vmul.f32 0.00390625, %v1643_v13 }
 0x520   :  { %v1658_v1 = vpop.xlane.xlu1 %1657 }
 0x521   :  { %vm1705_vm4 = vcmp.gt.f32.partialorder %v3105_v46, %v1689_v23  ;;  %vm1706_vm5 = vcmp.gt.f32.partialorder %v3114_v35, %v1689_v23  ;;  %v1694_v48 = vmul.f32 0.00390625, %v1658_v1 }
 0x522   :  { %v1915_v30 = vsel %vm1705_vm4, 1.0, %v2401_v38  ;;  %v1916_v56 = vsel %vm1706_vm5, 1.0, %v2401_v38  ;;  %v1655_v24 = vpop.xlane.xlu0 %1654 }
 0x523   :  { %1801 = vst [vmem:[#allocation5] sm:$0xff] %v1915_v30  ;;  %1802 = vst [vmem:[#allocation5 + $0x8] sm:$0xff] %v1916_v56  ;;  %vm1715_vm6 = vcmp.gt.f32.partialorder %v3127_v61, %v1694_v48  ;;  %vm1716_vm7 = vcmp.gt.f32.partialorder %v3134_v12, %v1694_v48  ;;  %v1693_v26 = vmul.f32 0.00390625, %v1655_v24 }
 0x524   :  { %v1925_v55 = vsel %vm1715_vm6, 1.0, %v2401_v38  ;;  %v1926_v52 = vsel %vm1716_vm7, 1.0, %v2401_v38  ;;  %v1649_v46 = vpop.xlane.xlu1 %1648 }
 0x525   :  { %1811 = vst [vmem:[#allocation5 + $0x50] sm:$0xff] %v1925_v55  ;;  %1812 = vst [vmem:[#allocation5 + $0x58] sm:$0xff] %v1926_v52  ;;  %vm1713_vm8 = vcmp.gt.f32.partialorder %v3109_v58, %v1693_v26  ;;  %vm1714_vm9 = vcmp.gt.f32.partialorder %v3116_v21, %v1693_v26  ;;  %v1691_v35 = vmul.f32 0.00390625, %v1649_v46 }
 0x526   :  { %v1923_v40 = vsel %vm1713_vm8, 1.0, %v2401_v38  ;;  %v1924_v42 = vsel %vm1714_vm9, 1.0, %v2401_v38 }
 0x527   :  { %1809 = vst [vmem:[#allocation5 + $0x40] sm:$0xff] %v1923_v40  ;;  %1810 = vst [vmem:[#allocation5 + $0x48] sm:$0xff] %v1924_v42  ;;  %vm1709_vm10 = vcmp.gt.f32.partialorder %v3136_v25, %v1691_v35  ;;  %vm1710_vm11 = vcmp.gt.f32.partialorder %v3142_v47, %v1691_v35 }
 0x528   :  { %v1919_v61 = vsel %vm1709_vm10, 1.0, %v2401_v38  ;;  %v1920_v12 = vsel %vm1710_vm11, 1.0, %v2401_v38 }
 0x529   :  { %1805 = vst [vmem:[#allocation5 + $0x20] sm:$0xff] %v1919_v61  ;;  %1806 = vst [vmem:[#allocation5 + $0x28] sm:$0xff] %v1920_v12 }
 0x532   :  { %v1646_v58 = vpop.xlane.xlu0 %1645 }
 0x533   :  { %v1690_v50 = vmul.f32 0.00390625, %v1646_v58 }
 0x534   :  { %v1652_v21 = vpop.xlane.xlu1 %1651 }
 0x535   :  { %vm1707_vm12 = vcmp.gt.f32.partialorder %v3119_v4, %v1690_v50  ;;  %vm1708_vm13 = vcmp.gt.f32.partialorder %v3132_v62, %v1690_v50  ;;  %v1692_v51 = vmul.f32 0.00390625, %v1652_v21 }
 0x536   :  { %v1917_v6 = vsel %vm1707_vm12, 1.0, %v2401_v38  ;;  %v1918_v25 = vsel %vm1708_vm13, 1.0, %v2401_v38  ;;  %v1661_v11 = vpop.xlane.xlu0 %1660 }
 0x537   :  { %1803 = vst [vmem:[#allocation5 + $0x10] sm:$0xff] %v1917_v6  ;;  %1804 = vst [vmem:[#allocation5 + $0x18] sm:$0xff] %v1918_v25  ;;  %vm1711_vm14 = vcmp.gt.f32.partialorder %v3149_v18, %v1692_v51  ;;  %vm1712_vm15 = vcmp.gt.f32.partialorder %v3161_v15, %v1692_v51  ;;  %v1695_v47 = vmul.f32 0.00390625, %v1661_v11 }
 0x538   :  { %v1921_v36 = vsel %vm1711_vm14, 1.0, %v2401_v38  ;;  %v1922_v32 = vsel %vm1712_vm15, 1.0, %v2401_v38  ;;  %v1664_v4 = vpop.xlane.xlu1 %1663 }
 0x539   :  { %1807 = vst [vmem:[#allocation5 + $0x30] sm:$0xff] %v1921_v36  ;;  %1808 = vst [vmem:[#allocation5 + $0x38] sm:$0xff] %v1922_v32  ;;  %vm1717_vm0 = vcmp.gt.f32.partialorder %v3138_v44, %v1695_v47  ;;  %vm1718_vm1 = vcmp.gt.f32.partialorder %v3145_v2, %v1695_v47  ;;  %v1696_v62 = vmul.f32 0.00390625, %v1664_v4 }
 0x53a   :  { %v1927_v22 = vsel %vm1717_vm0, 1.0, %v2401_v38  ;;  %v1928_v3 = vsel %vm1718_vm1, 1.0, %v2401_v38  ;;  %v1667_v18 = vpop.xlane.xlu0 %1666 }
 0x53b   :  { %1813 = vst [vmem:[#allocation5 + $0x60] sm:$0xff] %v1927_v22  ;;  %1814 = vst [vmem:[#allocation5 + $0x68] sm:$0xff] %v1928_v3  ;;  %vm1719_vm2 = vcmp.gt.f32.partialorder %v3157_v7, %v1696_v62  ;;  %vm1720_vm3 = vcmp.gt.f32.partialorder %v3171_v45, %v1696_v62  ;;  %v1697_v15 = vmul.f32 0.00390625, %v1667_v18 }
 0x53c   :  { %v1929_v19 = vsel %vm1719_vm2, 1.0, %v2401_v38  ;;  %v1930_v49 = vsel %vm1720_vm3, 1.0, %v2401_v38  ;;  %v1670_v44 = vpop.xlane.xlu1 %1669 }
 0x53d   :  { %1815 = vst [vmem:[#allocation5 + $0x70] sm:$0xff] %v1929_v19  ;;  %1816 = vst [vmem:[#allocation5 + $0x78] sm:$0xff] %v1930_v49  ;;  %vm1721_vm4 = vcmp.gt.f32.partialorder %v3175_v43, %v1697_v15  ;;  %vm1722_vm5 = vcmp.gt.f32.partialorder %v3181_v20, %v1697_v15  ;;  %v1698_v2 = vmul.f32 0.00390625, %v1670_v44 }
 0x53e   :  { %v1931_v34 = vsel %vm1721_vm4, 1.0, %v2401_v38  ;;  %v1932_v57 = vsel %vm1722_vm5, 1.0, %v2401_v38  ;;  %v1673_v7 = vpop.xlane.xlu0 %1672 }
 0x53f   :  { %1817 = vst [vmem:[#allocation5 + $0x80] sm:$0xff] %v1931_v34  ;;  %1818 = vst [vmem:[#allocation5 + $0x88] sm:$0xff] %v1932_v57  ;;  %vm1723_vm6 = vcmp.gt.f32.partialorder %v3183_v17, %v1698_v2  ;;  %vm1724_vm7 = vcmp.gt.f32.partialorder %v3188_v60, %v1698_v2  ;;  %v1699_v45 = vmul.f32 0.00390625, %v1673_v7 }
 0x540   :  { %v1933_v53 = vsel %vm1723_vm6, 1.0, %v2401_v38  ;;  %v1934_v31 = vsel %vm1724_vm7, 1.0, %v2401_v38  ;;  %v1676_v43 = vpop.xlane.xlu1 %1675 }
 0x541   :  { %1819 = vst [vmem:[#allocation5 + $0x90] sm:$0xff] %v1933_v53  ;;  %1820 = vst [vmem:[#allocation5 + $0x98] sm:$0xff] %v1934_v31  ;;  %vm1725_vm8 = vcmp.gt.f32.partialorder %v3191_v63, %v1699_v45  ;;  %vm1726_vm9 = vcmp.gt.f32.partialorder %v3197_v54, %v1699_v45  ;;  %v1700_v20 = vmul.f32 0.00390625, %v1676_v43 }
 0x542   :  { %v1935_v59 = vsel %vm1725_vm8, 1.0, %v2401_v38  ;;  %v1936_v0 = vsel %vm1726_vm9, 1.0, %v2401_v38  ;;  %v1679_v17 = vpop.xlane.xlu0 %1678 }
 0x543   :  { %1821 = vst [vmem:[#allocation5 + $0xa0] sm:$0xff] %v1935_v59  ;;  %1822 = vst [vmem:[#allocation5 + $0xa8] sm:$0xff] %v1936_v0  ;;  %vm1727_vm10 = vcmp.gt.f32.partialorder %v3199_v16, %v1700_v20  ;;  %vm1728_vm11 = vcmp.gt.f32.partialorder %v3203_v28, %v1700_v20  ;;  %v1701_v60 = vmul.f32 0.00390625, %v1679_v17 }
 0x544   :  { %v1937_v9 = vsel %vm1727_vm10, 1.0, %v2401_v38  ;;  %v1938_v10 = vsel %vm1728_vm11, 1.0, %v2401_v38  ;;  %v1682_v63 = vpop.xlane.xlu1 %1681 }
 0x545   :  { %1823 = vst [vmem:[#allocation5 + $0xb0] sm:$0xff] %v1937_v9  ;;  %1824 = vst [vmem:[#allocation5 + $0xb8] sm:$0xff] %v1938_v10  ;;  %vm1729_vm12 = vcmp.gt.f32.partialorder %v3205_v29, %v1701_v60  ;;  %vm1730_vm13 = vcmp.gt.f32.partialorder %v3209_v8, %v1701_v60  ;;  %v1702_v54 = vmul.f32 0.00390625, %v1682_v63 }
 0x546   :  { %v1939_v14 = vsel %vm1729_vm12, 1.0, %v2401_v38  ;;  %v1940_v13 = vsel %vm1730_vm13, 1.0, %v2401_v38  ;;  %v1685_v16 = vpop.xlane.xlu0 %1684 }
 0x547   :  { %1825 = vst [vmem:[#allocation5 + $0xc0] sm:$0xff] %v1939_v14  ;;  %1826 = vst [vmem:[#allocation5 + $0xc8] sm:$0xff] %v1940_v13  ;;  %vm1731_vm14 = vcmp.gt.f32.partialorder %v3211_v5, %v1702_v54  ;;  %vm1732_vm15 = vcmp.gt.f32.partialorder %v3215_v37, %v1702_v54  ;;  %v1703_v28 = vmul.f32 0.00390625, %v1685_v16 }
 0x548   :  { %v1941_v23 = vsel %vm1731_vm14, 1.0, %v2401_v38  ;;  %v1942_v1 = vsel %vm1732_vm15, 1.0, %v2401_v38 }
 0x549   :  { %1827 = vst [vmem:[#allocation5 + $0xd0] sm:$0xff] %v1941_v23  ;;  %1828 = vst [vmem:[#allocation5 + $0xd8] sm:$0xff] %v1942_v1  ;;  %vm1733_vm0 = vcmp.gt.f32.partialorder %v3217_v41, %v1703_v28  ;;  %vm1734_vm1 = vcmp.gt.f32.partialorder %v3223_v39, %v1703_v28 }
 0x54a   :  { %v1943_v29 = vsel %vm1733_vm0, 1.0, %v2401_v38  ;;  %v1944_v8 = vsel %vm1734_vm1, 1.0, %v2401_v38 }
 0x54b   :  { %1829 = vst [vmem:[#allocation5 + $0xe0] sm:$0xff] %v1943_v29  ;;  %1830 = vst [vmem:[#allocation5 + $0xe8] sm:$0xff] %v1944_v8 }
 0x554   :  { %v1688_v5 = vpop.xlane.xlu1 %1687 }
 0x555   :  { %v1704_v37 = vmul.f32 0.00390625, %v1688_v5 }
 0x557   :  { %vm1735_vm2 = vcmp.gt.f32.partialorder %v3229_v27, %v1704_v37  ;;  %vm1736_vm3 = vcmp.gt.f32.partialorder %v3231_v33, %v1704_v37 }
 0x558   :  { %v1945_v48 = vsel %vm1735_vm2, 1.0, %v2401_v38  ;;  %v1946_v41 = vsel %vm1736_vm3, 1.0, %v2401_v38 }
 0x559   :  { %1831 = vst [vmem:[#allocation5 + $0xf0] sm:$0xff] %v1945_v48  ;;  %1832 = vst [vmem:[#allocation5 + $0xf8] sm:$0xff] %v1946_v41 }
 0x55a   :  { %2381 = shalt.err (!%p2378_p6)
}
 0x55b   :  { %s2382_s10 = scalar_lea.hbm %s3332_s6, 4096 }
 0x55c   :  { %p2383_p7 = scmp.ne.s32.totalorder %s3332_s6, %s2382_s10  ;;  %p2386_p8 = scmp.lt.u32.totalorder %s2382_s10, %s3332_s6 }
 0x55e   :  { %p2388_p9 = pnand %p2386_p8, %p2383_p7 }
 0x560   :  { %2391 = shalt.err (!%p2388_p9)
}
 0x561   :  { %1844 = dma.vmem_to_hbm [thread:$0]  %s1839_s30, 4096, %s3332_s6, [#allocation4], %s2399_s11, %s2399_s11, %s2400_s12  }
 0x562   :  { %2394 = dma.done.wait [#allocation4], 4096  }
 0x563   :  { %2395 = vsyncadd [#allocation4], 4294963200 }
 0x564   :  { %2396 = dma.done.wait [#allocation7], 32  }
 0x565   :  { %2397 = vsyncadd [#allocation7], 4294967264 }
 0x566   :  { %1861 = vsyncpa [#allocation3], 1 }
 0x567   :  { %1862 = vsyncpa [#allocation4], 1 }
 0x568   :  { %1863 = vsyncpa [#allocation7], 1 }

</bundles_post_ra>
